<compile_context>
chip_gen: v6e
topology: v6e:2x2x1
jax: 0.10.0
libtpu: 0.0.40
codegen_flags: <defaults>
</compile_context>

<pallas_src>
import math
from functools import lru_cache

import jax
import jax.numpy as jnp
from jax.experimental import pallas as pl
from jax.experimental.pallas import tpu as pltpu

F32 = jnp.float32
BF16 = jnp.bfloat16
_VMEM_LIMIT = 48 * 1024 * 1024      # under v7x's 64 MiB physical VMEM; fine on v5e/v6e

GROWTH = 48
BN_SIZE = 4
INIT_FEATURES = 96
BLOCK_CONFIG = (6, 12, 36, 24)      # densenet161
BN_EPS = 1e-5


def _ru(x, m):
    return (x + m - 1) // m * m


def _pad2(a, rows, cols):
    r, c = a.shape
    if r == rows and c == cols:
        return a
    return jnp.pad(a, ((0, rows - r), (0, cols - c)))


# --------------------------- Pallas kernels (memoized per padded shape) ---------------------------

@lru_cache(maxsize=None)
def _matmul_fn(mp, kp, cop, tm):
    """out[mp, cop] = A[mp, kp] @ W[kp, cop]; bf16 in / f32 out, grid over the pixel axis."""
    def kernel(a_ref, w_ref, o_ref):
        o_ref[...] = jnp.dot(a_ref[...], w_ref[...],
                             preferred_element_type=jnp.float32)

    fn = pl.pallas_call(
        kernel,
        out_shape=jax.ShapeDtypeStruct((mp, cop), F32),
        grid=(mp // tm,),
        in_specs=[pl.BlockSpec((tm, kp), lambda i: (i, 0)),
                  pl.BlockSpec((kp, cop), lambda i: (0, 0))],
        out_specs=pl.BlockSpec((tm, cop), lambda i: (i, 0)),
        compiler_params=pltpu.CompilerParams(
            dimension_semantics=("parallel",),
            vmem_limit_bytes=_VMEM_LIMIT),
    )
    return jax.jit(fn)


@lru_cache(maxsize=None)
def _affine_matmul_fn(mp, kp, cop, tm):
    """Fused norm+relu+1x1conv: out = relu(A*scale + shift) @ W  (A f32, W bf16, acc f32)."""
    def kernel(a_ref, s_ref, t_ref, w_ref, o_ref):
        a = a_ref[...] * s_ref[...] + t_ref[...]
        a = jnp.maximum(a, 0.0).astype(jnp.bfloat16)
        o_ref[...] = jnp.dot(a, w_ref[...], preferred_element_type=jnp.float32)

    fn = pl.pallas_call(
        kernel,
        out_shape=jax.ShapeDtypeStruct((mp, cop), F32),
        grid=(mp // tm,),
        in_specs=[pl.BlockSpec((tm, kp), lambda i: (i, 0)),
                  pl.BlockSpec((1, kp), lambda i: (0, 0)),
                  pl.BlockSpec((1, kp), lambda i: (0, 0)),
                  pl.BlockSpec((kp, cop), lambda i: (0, 0))],
        out_specs=pl.BlockSpec((tm, cop), lambda i: (i, 0)),
        compiler_params=pltpu.CompilerParams(
            dimension_semantics=("parallel",),
            vmem_limit_bytes=_VMEM_LIMIT),
    )
    return jax.jit(fn)


@lru_cache(maxsize=None)
def _stats_fn(m, cp):
    """Per-channel batch mean / biased variance of an (M, C) pixel-major map; grid over C."""
    def kernel(x_ref, mean_ref, var_ref):
        x = x_ref[...]
        mean = jnp.mean(x, axis=0, keepdims=True)
        var = jnp.mean(jnp.square(x - mean), axis=0, keepdims=True)
        mean_ref[...] = mean
        var_ref[...] = var

    fn = pl.pallas_call(
        kernel,
        out_shape=(jax.ShapeDtypeStruct((1, cp), F32),
                   jax.ShapeDtypeStruct((1, cp), F32)),
        grid=(cp // 128,),
        in_specs=[pl.BlockSpec((m, 128), lambda j: (0, j))],
        out_specs=(pl.BlockSpec((1, 128), lambda j: (0, j)),
                   pl.BlockSpec((1, 128), lambda j: (0, j))),
        compiler_params=pltpu.CompilerParams(
            dimension_semantics=("parallel",),
            vmem_limit_bytes=_VMEM_LIMIT),
    )
    return jax.jit(fn)


@lru_cache(maxsize=None)
def _affine_fn(mp, cp, tm, relu):
    """y = x*scale + shift (per-channel), optional ReLU; grid over (M, C) tiles."""
    def kernel(x_ref, s_ref, t_ref, o_ref):
        y = x_ref[...] * s_ref[...] + t_ref[...]
        if relu:
            y = jnp.maximum(y, 0.0)
        o_ref[...] = y

    fn = pl.pallas_call(
        kernel,
        out_shape=jax.ShapeDtypeStruct((mp, cp), F32),
        grid=(mp // tm, cp // 128),
        in_specs=[pl.BlockSpec((tm, 128), lambda i, j: (i, j)),
                  pl.BlockSpec((1, 128), lambda i, j: (0, j)),
                  pl.BlockSpec((1, 128), lambda i, j: (0, j))],
        out_specs=pl.BlockSpec((tm, 128), lambda i, j: (i, j)),
        compiler_params=pltpu.CompilerParams(
            dimension_semantics=("parallel", "parallel"),
            vmem_limit_bytes=_VMEM_LIMIT),
    )
    return jax.jit(fn)


@lru_cache(maxsize=None)
def _pool_fn(kk, mp, cp, tm, op):
    """Reduce kk pooling taps stacked on axis 0 of a (kk, M, C) array; grid over (M, C)."""
    def kernel(w_ref, o_ref):
        acc = w_ref[0]
        for k in range(1, kk):
            nxt = w_ref[k]
            acc = jnp.maximum(acc, nxt) if op == "max" else acc + nxt
        if op == "avg":
            acc = acc * (1.0 / kk)
        o_ref[...] = acc

    fn = pl.pallas_call(
        kernel,
        out_shape=jax.ShapeDtypeStruct((mp, cp), F32),
        grid=(mp // tm, cp // 128),
        in_specs=[pl.BlockSpec((kk, tm, 128), lambda i, j: (0, i, j))],
        out_specs=pl.BlockSpec((tm, 128), lambda i, j: (i, j)),
        compiler_params=pltpu.CompilerParams(
            dimension_semantics=("parallel", "parallel"),
            vmem_limit_bytes=_VMEM_LIMIT),
    )
    return jax.jit(fn)


@lru_cache(maxsize=None)
def _linear_fn(np_, kp, op_, tk):
    """Classifier: K-gridded bf16 matmul with f32 accumulator scratch + bias."""
    def kernel(x_ref, w_ref, b_ref, o_ref, acc_ref):
        @pl.when(pl.program_id(0) == 0)
        def _():
            acc_ref[...] = jnp.zeros_like(acc_ref)

        acc_ref[...] += jnp.dot(x_ref[...], w_ref[...],
                                preferred_element_type=jnp.float32)

        @pl.when(pl.program_id(0) == pl.num_programs(0) - 1)
        def _():
            o_ref[...] = acc_ref[...] + b_ref[...]

    fn = pl.pallas_call(
        kernel,
        out_shape=jax.ShapeDtypeStruct((np_, op_), F32),
        grid=(kp // tk,),
        in_specs=[pl.BlockSpec((np_, tk), lambda k: (0, k)),
                  pl.BlockSpec((tk, op_), lambda k: (k, 0)),
                  pl.BlockSpec((1, op_), lambda k: (0, 0))],
        out_specs=pl.BlockSpec((np_, op_), lambda k: (0, 0)),
        scratch_shapes=[pltpu.VMEM((np_, op_), F32)],
        compiler_params=pltpu.CompilerParams(
            dimension_semantics=("arbitrary",),
            vmem_limit_bytes=_VMEM_LIMIT),
    )
    return jax.jit(fn)


# --------------------------- wrappers (padding / im2col glue) ---------------------------

def pallas_matmul_bf16(a_bf16, w_bf16):
    m, k = a_bf16.shape
    _, co = w_bf16.shape
    kp, cop = _ru(k, 128), _ru(co, 128)
    tm = min(512, _ru(m, 128))
    mp = _ru(m, tm)
    ap = _pad2(a_bf16, mp, kp)
    wp = _pad2(w_bf16, kp, cop)
    return _matmul_fn(mp, kp, cop, tm)(ap, wp)[:m, :co]


def bn_relu_conv1x1(x_f32, scale, shift, w_co_ci):
    """Fused BN(affine)+ReLU+1x1 conv on a pixel-major (M, C) map."""
    m, c = x_f32.shape
    co = w_co_ci.shape[0]
    kp, cop = _ru(c, 128), _ru(co, 128)
    tm = min(512, _ru(m, 128))
    mp = _ru(m, tm)
    xp = _pad2(x_f32, mp, kp)
    sp = _pad2(scale.reshape(1, c), 1, kp)
    tp = _pad2(shift.reshape(1, c), 1, kp)
    wp = _pad2(w_co_ci.T.astype(BF16), kp, cop)
    return _affine_matmul_fn(mp, kp, cop, tm)(xp, sp, tp, wp)[:m, :co]


def channel_stats(x_f32):
    m, c = x_f32.shape
    cp = _ru(c, 128)
    xp = _pad2(x_f32, m, cp)
    mean, var = _stats_fn(m, cp)(xp)
    return mean[0, :c], var[0, :c]


def bn_scale_shift(gamma, beta, mean, var):
    scale = gamma * jax.lax.rsqrt(var + BN_EPS)
    shift = beta - mean * scale
    return scale, shift


def apply_affine(x_f32, scale, shift, relu):
    m, c = x_f32.shape
    cp = _ru(c, 128)
    tm = min(512, _ru(m, 8))
    mp = _ru(m, tm)
    xp = _pad2(x_f32, mp, cp)
    sp = _pad2(scale.reshape(1, c), 1, cp)
    tp = _pad2(shift.reshape(1, c), 1, cp)
    return _affine_fn(mp, cp, tm, bool(relu))(xp, sp, tp)[:m, :c]


def conv2d_pm(x_f32, nhw, weight, stride, pad):
    """Conv2d via bf16 im2col + MXU matmul; x is pixel-major (M, C)."""
    co, ci, kh, kw = weight.shape
    m, c = x_f32.shape
    n, h, w = nhw
    ho = (h + 2 * pad - kh) // stride + 1
    wo = (w + 2 * pad - kw) // stride + 1
    xb = x_f32.astype(BF16)
    if kh == 1 and kw == 1 and stride == 1 and pad == 0:
        patches = xb
    else:
        x4 = xb.reshape(n, h, w, c)
        if pad:
            x4 = jnp.pad(x4, ((0, 0), (pad, pad), (pad, pad), (0, 0)))
        taps = [x4[:, i:i + stride * ho:stride, j:j + stride * wo:stride, :]
                for i in range(kh) for j in range(kw)]
        # taps stacked on the LAST axis -> K order (channel-major, tap-minor),
        # matching weight.reshape(co, ci*kh*kw).
        patches = jnp.stack(taps, axis=-1).reshape(n * ho * wo, c * kh * kw)
        # TODO(synk): replace im2col glue with a K-grid of shifted, accumulated matmuls
        # reading the padded map directly (needs Element-offset index_maps).
    wmat = weight.reshape(co, ci * kh * kw).T.astype(BF16)
    out = pallas_matmul_bf16(patches, wmat)
    return out, (n, ho, wo)


def pool2d_pm(x_f32, nhw, ksize, stride, pad, op):
    m, c = x_f32.shape
    n, h, w = nhw
    x4 = x_f32.reshape(n, h, w, c)
    if pad:
        pad_val = -jnp.inf if op == "max" else 0.0
        x4 = jnp.pad(x4, ((0, 0), (pad, pad), (pad, pad), (0, 0)),
                     constant_values=pad_val)
    ho = (h + 2 * pad - ksize) // stride + 1
    wo = (w + 2 * pad - ksize) // stride + 1
    taps = [x4[:, i:i + stride * ho:stride, j:j + stride * wo:stride, :]
            for i in range(ksize) for j in range(ksize)]
    kk = ksize * ksize
    mo = n * ho * wo
    wins = jnp.stack(taps, axis=0).reshape(kk, mo, c)
    cp = _ru(c, 128)
    tm = min(512, _ru(mo, 8))
    mp = _ru(mo, tm)
    wins_p = jnp.pad(wins, ((0, 0), (0, mp - mo), (0, cp - c)))
    out = _pool_fn(kk, mp, cp, tm, op)(wins_p)[:mo, :c]
    return out, (n, ho, wo)


def pallas_linear(x, w, b):
    n, f = x.shape
    o = w.shape[0]
    np_, op_ = _ru(n, 8), _ru(o, 128)
    tk = min(1024, _ru(f, 128))
    kp = _ru(f, tk)
    xp = _pad2(x.astype(BF16), np_, kp)
    wp = _pad2(w.T.astype(BF16), kp, op_)
    bp = _pad2(b.reshape(1, o).astype(F32), 1, op_)
    return _linear_fn(np_, kp, op_, tk)(xp, wp, bp)[:n, :o]


# --------------------------- parameters (deterministic, kaiming as in the module) ---------------------------

def _kaiming_conv(key, co, ci, kh, kw):
    fan_in = ci * kh * kw
    return jax.random.normal(key, (co, ci, kh, kw), F32) * math.sqrt(2.0 / fan_in)


def build_params(key, n_inputs=12, num_cls=17, feat_hw=(2, 2)):
    keys = iter(jax.random.split(key, 512))
    p = {"conv0": _kaiming_conv(next(keys), INIT_FEATURES, n_inputs, 7, 7),
         "norm0": (jnp.ones(INIT_FEATURES, F32), jnp.zeros(INIT_FEATURES, F32)),
         "blocks": [], "trans": []}
    c = INIT_FEATURES
    for bi, n_layers in enumerate(BLOCK_CONFIG):
        layers = []
        for _ in range(n_layers):
            layers.append({
                "n1": (jnp.ones(c, F32), jnp.zeros(c, F32)),
                "c1": _kaiming_conv(next(keys), BN_SIZE * GROWTH, c, 1, 1),
                "n2": (jnp.ones(BN_SIZE * GROWTH, F32), jnp.zeros(BN_SIZE * GROWTH, F32)),
                "c2": _kaiming_conv(next(keys), GROWTH, BN_SIZE * GROWTH, 3, 3),
            })
            c += GROWTH
        p["blocks"].append(layers)
        if bi != len(BLOCK_CONFIG) - 1:
            p["trans"].append({"n": (jnp.ones(c, F32), jnp.zeros(c, F32)),
                               "c": _kaiming_conv(next(keys), c // 2, c, 1, 1)})
            c //= 2
    p["norm5"] = (jnp.ones(c, F32), jnp.zeros(c, F32))          # c == 2208
    feat_dim = c * feat_hw[0] * feat_hw[1]                      # == 141312 for 256x256 inputs
    wk, bk = next(keys), next(keys)
    p["fc_w"] = jax.random.normal(wk, (num_cls, feat_dim), F32) * math.sqrt(2.0 / feat_dim)
    bound = 1.0 / math.sqrt(feat_dim)
    p["fc_b"] = jax.random.uniform(bk, (num_cls,), F32, minval=-bound, maxval=bound)
    return p


# --------------------------- forward pass ---------------------------

def densenet161_forward(params, x_nchw):
    n, c_in, h, w = x_nchw.shape
    x = jnp.transpose(x_nchw, (0, 2, 3, 1)).reshape(n * h * w, c_in).astype(F32)
    nhw = (n, h, w)

    # conv0 / norm0 / relu0 / pool0  (training-mode BN: batch statistics)
    x, nhw = conv2d_pm(x, nhw, params["conv0"], stride=2, pad=3)
    mean, var = channel_stats(x)
    s0, t0 = bn_scale_shift(*params["norm0"], mean, var)
    x = apply_affine(x, s0, t0, relu=True)
    x, nhw = pool2d_pm(x, nhw, ksize=3, stride=2, pad=1, op="max")

    means, vars_ = [], []
    for bi, layers in enumerate(params["blocks"]):
        concat = x
        m0, v0 = channel_stats(x)
        means, vars_ = [m0], [v0]
        for lp in layers:
            mean_c = jnp.concatenate(means)
            var_c = jnp.concatenate(vars_)
            s1, t1 = bn_scale_shift(*lp["n1"], mean_c, var_c)
            y = bn_relu_conv1x1(concat, s1, t1, lp["c1"][:, :, 0, 0])   # norm1+relu1+conv1 fused
            m2, v2 = channel_stats(y)
            s2, t2 = bn_scale_shift(*lp["n2"], m2, v2)
            y = apply_affine(y, s2, t2, relu=True)                      # norm2+relu2
            y, _ = conv2d_pm(y, nhw, lp["c2"], stride=1, pad=1)         # conv2 3x3, growth=48
            mc, vc = channel_stats(y)                                   # stats once per chunk
            means.append(mc)
            vars_.append(vc)
            # TODO(synk): replace the growing concat (O(L^2) HBM glue copies) with a
            # preallocated channel buffer + scalar-prefetch K-grid reads inside the conv kernel.
            concat = jnp.concatenate([concat, y], axis=1)
        x = concat
        if bi < len(params["trans"]):
            tp = params["trans"][bi]
            mean_c = jnp.concatenate(means)
            var_c = jnp.concatenate(vars_)
            st, tt = bn_scale_shift(*tp["n"], mean_c, var_c)
            x = bn_relu_conv1x1(x, st, tt, tp["c"][:, :, 0, 0])         # transition norm+relu+1x1
            x, nhw = pool2d_pm(x, nhw, ksize=2, stride=2, pad=0, op="avg")

    # norm5 (encoder Sequential ends at norm5, no ReLU)
    mean_c = jnp.concatenate(means)
    var_c = jnp.concatenate(vars_)
    s5, t5 = bn_scale_shift(*params["norm5"], mean_c, var_c)
    x = apply_affine(x, s5, t5, relu=False)

    # x.view(N, -1) in NCHW order, then classifier
    cf = x.shape[1]
    nn_, hf, wf = nhw
    feat = x.reshape(nn_, hf, wf, cf).transpose(0, 3, 1, 2).reshape(nn_, cf * hf * wf)
    return pallas_linear(feat, params["fc_w"], params["fc_b"])


if __name__ == "__main__":
    key = jax.random.PRNGKey(0)
    pkey, xkey = jax.random.split(key)
    # Small demo shape: 64x64 inputs instead of the 256x256 the reference classifier implies.
    # TODO(synk): with (N,12,256,256) inputs feat_hw=(8,8) and the classifier is exactly Linear(141312, 17).
    N, C_IN, H, W = 2, 12, 64, 64
    params = build_params(pkey, n_inputs=C_IN, num_cls=17, feat_hw=(H // 32, W // 32))
    x = jax.random.normal(xkey, (N, C_IN, H, W), F32)

    logits = densenet161_forward(params, x)
    jax.block_until_ready(logits)
    assert logits.shape == (N, 17)
    assert bool(jnp.all(jnp.isfinite(logits)))
    print("KERNEL_OK")
</pallas_src>

<mosaic_0001>
module attributes {stable_mosaic.version = 11 : i64} {
  func.func @kernel(%arg0: i32, %arg1: memref<512x640xbf16, #tpu.memory_space<vmem>>, %arg2: memref<640x128xbf16, #tpu.memory_space<vmem>>, %arg3: memref<512x128xf32, #tpu.memory_space<vmem>>) attributes {dimension_semantics = [#tpu.dimension_semantics<parallel>], iteration_bounds = array<i64: 4>, scalar_prefetch = 0 : i64, scratch_operands = 0 : i64, tpu.core_type = #tpu.core_type<tc>, window_params = [{transform_indices = @transform_0, window_bounds = array<i64: 512, 640>}, {pipeline_mode = #tpu.pipeline_mode<synchronous>, transform_indices = @transform_1, window_bounds = array<i64: 640, 128>}, {transform_indices = @transform_2, window_bounds = array<i64: 512, 128>}]} {
    %c0 = arith.constant 0 : index
    %c0_0 = arith.constant 0 : index
    %0 = vector.load %arg1[%c0, %c0_0] : memref<512x640xbf16, #tpu.memory_space<vmem>>, vector<512x640xbf16>
    %c0_1 = arith.constant 0 : index
    %c0_2 = arith.constant 0 : index
    %1 = vector.load %arg2[%c0_1, %c0_2] : memref<640x128xbf16, #tpu.memory_space<vmem>>, vector<640x128xbf16>
    %cst = arith.constant dense<0.000000e+00> : vector<512x128xf32>
    %2 = tpu.matmul %0, %1, %cst {dimension_numbers = #tpu.dot_dimension_numbers<[1], [0], [0], [1], [0, 0, 1, 1], [], []>} : vector<512x640xbf16>, vector<640x128xbf16>, vector<512x128xf32> -> vector<512x128xf32>
    %c0_3 = arith.constant 0 : index
    %c0_4 = arith.constant 0 : index
    %3 = vector.load %arg3[%c0_3, %c0_4] : memref<512x128xf32, #tpu.memory_space<vmem>>, vector<512x128xf32>
    tpu.vector_store %arg3[%c0_3, %c0_4], %2 {strides = array<i32>} : memref<512x128xf32, #tpu.memory_space<vmem>>, vector<512x128xf32>,
    return
  }
  func.func @transform_0(%arg0: i32) -> (i32, i32) {
    %c0_i32 = arith.constant 0 : i32
    %c0_i32_0 = arith.constant 0 : i32
    return %arg0, %c0_i32 : i32, i32
  }
  func.func @transform_1(%arg0: i32) -> (i32, i32) {
    %c0_i32 = arith.constant 0 : i32
    %c0_i32_0 = arith.constant 0 : i32
    %c0_i32_1 = arith.constant 0 : i32
    return %c0_i32, %c0_i32_0 : i32, i32
  }
  func.func @transform_2(%arg0: i32) -> (i32, i32) {
    %c0_i32 = arith.constant 0 : i32
    %c0_i32_0 = arith.constant 0 : i32
    return %arg0, %c0_i32 : i32, i32
  }
}

</mosaic_0001>

<bundles_post_ra>
// kernel: tpu_custom_call.1
= control target key start
LH: loop header
LB: loop body
LE: loop exit
PB: predicated region body
PF: predicated region fallthrough
CT: control target
= control target key end

     0   :  { %7 = vsyncpa [#allocation3], 0  ;;  %s4196_s0 = inlined_call_operand.hbm [shape: bf16[2048,640], index: 0, kind: input, shape index: {}]   ;;  %s4197_s1 = inlined_call_operand.hbm [shape: bf16[640,128], index: 1, kind: input, shape index: {}]   ;;  %s4198_s2 = inlined_call_operand.hbm [shape: f32[2048,128], index: 2, kind: output, shape index: {}]  }
   0x1   :  { %9 = vsyncpa [#allocation3 + $0x1], 0 }
   0x2   :  { %10 = vsyncpa [#allocation6], 0 }
   0x3   :  { %11 = vsyncpa [#allocation4], 0 }
   0x4   :  { %13 = vsyncpa [#allocation4 + $0x1], 0  ;;  %s3401_s9 = smov 0   ;;  %s3403_s10 = smov 0  }
   0x5   :  { %s3405_s11 = smov 0   ;;  %s3407_s12 = smov 0  }
   0x6 LB: > { %s3422_s13 = sadd.s32 4294967295, %s3374_s12   ;;  %s2553_s14 = sadd.s32 4294967294, %s3374_s12   ;;  %s3374_s12 = sphi %s3407_s12, %s4243_s12   ;;  %s3370_s11 = sphi %s3405_s11, %s4242_s11   ;;  %s3366_s10 = sphi %s3403_s10, %s4241_s10   ;;  %s3362_s9 = sphi %s3401_s9, %s4240_s9  }
   0x7   : > { %p39_p0 = scmp.ne.s32.totalorder %s3366_s10, %s3362_s9  ;;  %p4199_p1 = scmp.eq.s32.totalorder %s3422_s13, 0 }
   0x8   : > { %p90_p3 = scmp.eq.s32.totalorder %s2553_s14, 3  ;;  %p2554_p5 = scmp.ge.s32.totalorder %s3374_s12, 1 }
   0x9   : > { %p3431_p4 = por %p4199_p1, %p39_p0  ;;  %p97_p7 = scmp.lt.s32.totalorder %s3374_s12, 5 }
   0xa   : > { %p3436_p6 = por %p90_p3, %p39_p0  ;;  %s3376_s18 = smov [#allocation5]  }
   0xb   : > { %s4203_s15 = scalar_select %p3431_p4, 1, 0 }
   0xc   : > { %s4204_s16 = scalar_select %p3436_p6, 1, 0 }
   0xd   : > { %p3441_p8 = pnand %p2554_p5, %p97_p7  ;;  %s109_s19 = sshll.u32 %s3376_s18, 4  ;;  %s110_s19 = int_to_ptr.vmem [resolvable:$true] %s109_s19 }
   0xe   : > { %s3454_s21 = sadd.s32 1, %s3374_s12   ;;  %s26_s22 = sadd.s32 1, %s3370_s11 }
   0xf   : > { %s4205_s17 = scalar_select %p3441_p8, 1, 0 }
  0x10   : > { %p2932_p9 = pneg %p3441_p8  ;;  %s23_s23 = ssub.s32 %s3374_s12, %s3454_s21 }
  0x11   : > { %s3263_s24 = scalar_lea.vmem %s110_s19, 5120  ;;  %p3271_p3 = scmp.lt.s32.totalorder %s110_s19, %s110_s19 }
  0x12   : > { %p3449_p10 = pnand %p2932_p9, %p4199_p1  ;;  %p3264_p12 = scmp.ne.s32.totalorder %s110_s19, %s3263_s24 }
  0x13   : > { %p3272_p5 = scmp.lt.s32.totalorder %s3263_s24, %s3263_s24 }
  0x14   : > { %p3254_p11 = pneg %p3449_p10 }
  0x15   : > { %p3273_p7 = por %p3272_p5, %p3271_p3 }
  0x16   : > { %p3266_p13 = pnand %p3264_p12, %p3254_p11 }
  0x18   : > { %p3267_p0 = pneg %p3266_p13 }
  0x1a   : > { %p3274_p2 = pnand %p3273_p7, %p3267_p0 }
  0x1c   : > { %3277 = shalt.err (!%p3274_p2)
}
  0x1d   : > { %s3377_s25 = smov 64   ;;  %s3378_s26 = smov 4  }
  0x1e   : > { %2935 = dma.hbm_to_vmem [thread:$0]  (!%p3449_p10), %s4197_s1, 5120, %s110_s19, [#allocation6], %s3377_s25, %s3377_s25, %s3378_s26  }
  0x1f   : > { %p24_p9 = scmp.eq.s32.totalorder %s23_s23, 0  ;;  %p33_p11 = scmp.ne.s32.totalorder %s3370_s11, %s3366_s10 }
  0x20   : > { %p34_p12 = scmp.eq.s32.totalorder %s3374_s12, 0  ;;  %p2945_p2 = scmp.lt.s32.totalorder %s3374_s12, 4 }
  0x21   : > { %s3471_s29 = scalar_select %p24_p9, %s3370_s11, %s26_s22  }
  0x22   : > { %p35_p13 = por %p34_p12, %p33_p11  ;;  %p4207_p0 = scmp.eq.s32.totalorder %s3422_s13, 3 }
  0x23   : > { %s123_s3 = sand.u32 1, %s3370_s11   ;;  %s2922_s4 = smul.u32 20480, %s3374_s12 }
  0x24   : > { %p3475_p3 = por %p4207_p0, %p33_p11  ;;  %s2921_s5 = smul.u32 1280, %s123_s3 }
  0x25   : > { %s3484_s8 = scalar_lea.hbm %s4196_s0, %s2922_s4  ;;  %p3486_p10 = pnand %p2945_p2, %p35_p13 }
  0x26   : > { %s4208_s30 = scalar_select %p3475_p3, 1, 0 }
  0x27   : > { %s127_s18 = scalar_lea.vmem [#allocation2], %s2921_s5  ;;  %s3492_s20 = scalar_lea.sflag [#allocation3], %s123_s3 }
  0x28   : > { %s135_s19 = sshll.u32 %s127_s18, 4  ;;  %s3278_s22 = scalar_lea.hbm %s3484_s8, 20480  ;;  %s3490_s19 = int_to_ptr.vmem [resolvable:$true] %s135_s19 }
  0x29   : > { %p3279_p5 = scmp.ne.s32.totalorder %s3484_s8, %s3278_s22  ;;  %p3280_p7 = pneg %p3486_p10 }
  0x2a   : > { %s3283_s25 = scalar_lea.hbm %s4196_s0, 81920  ;;  %p3284_p12 = scmp.lt.s32.totalorder %s3484_s8, %s4196_s0 }
  0x2b   : > { %p3281_p9 = pnand %p3280_p7, %p3279_p5  ;;  %p3285_p2 = scmp.lt.s32.totalorder %s3283_s25, %s3278_s22 }
  0x2d   : > { %p3282_p11 = pneg %p3281_p9  ;;  %p3286_p13 = por %p3285_p2, %p3284_p12 }
  0x2f   : > { %p3287_p0 = pnand %p3286_p13, %p3282_p11 }
  0x31   : > { %3290 = shalt.err (!%p3287_p0)
}
  0x32   : > { %s3291_s28 = scalar_lea.vmem %s3490_s19, 20480  ;;  %s3379_s3 = smov [#allocation2]  }
  0x33   : > { %p3292_p1 = scmp.ne.s32.totalorder %s3490_s19, %s3291_s28  ;;  %s3296_s4 = sshll.u32 %s3379_s3, 4  ;;  %s3297_s4 = int_to_ptr.vmem [resolvable:$false] %s3296_s4 }
  0x34   : > { %s3298_s5 = scalar_lea.vmem %s3297_s4, 40960  ;;  %p3299_p9 = scmp.lt.s32.totalorder %s3490_s19, %s3297_s4 }
  0x35   : > { %p3294_p6 = pnand %p3292_p1, %p3280_p7  ;;  %p3300_p3 = scmp.lt.s32.totalorder %s3298_s5, %s3291_s28 }
  0x37   : > { %p3295_p5 = pneg %p3294_p6  ;;  %p3301_p4 = por %p3300_p3, %p3299_p9 }
  0x39   : > { %p3302_p8 = pnand %p3301_p4, %p3295_p5 }
  0x3b   : > { %3305 = shalt.err (!%p3302_p8)
}
  0x3c   : > { %s3380_s6 = smov 320   ;;  %s3381_s7 = smov 20  }
  0x3d   : > { %2939 = dma.hbm_to_vmem [thread:$0]  (!%p3486_p10), %s3484_s8, 20480, %s3490_s19, %s3492_s20, %s3380_s6, %s3380_s6, %s3381_s7  }
  0x3e   : > { %p4210_p1 = scmp.ne.s32.totalorder %s4205_s17, 0 }
  0x40   : > { %147 = sbr.rel (%p4210_p1) target bundleno = 669 (0x29d), region = 28 }
  0x45   : > { %s3516_s18 = sand.u32 1, %s3366_s10   ;;  %p4211_p4 = scmp.ne.s32.totalorder %s4203_s15, 0 }
  0x46   : > { %s2923_s22 = smul.u32 1280, %s3516_s18  ;;  %s150_s23 = scalar_lea.sflag [#allocation3], %s3516_s18 }
  0x48   : > { %s3520_s24 = scalar_lea.vmem [#allocation2], %s2923_s22 }
  0x49   : > { %3349 = dma.done.wait (%p4211_p4), %s150_s23, 20480  }
  0x4a   : > { %3351 = vsyncadd (%p4211_p4), %s150_s23, 4294946816  ;;  %p4212_p6 = scmp.eq.s32.totalorder %s3422_s13, 0 }
  0x4c   : > { %3353 = dma.done.wait (%p4212_p6), [#allocation6], 5120   ;;  %p4213_p8 = pmov %p4212_p6 }
  0x4d   : > { %v3382_v0 = vmov 0   ;;  %v2988_v1 = vld [vmem:[#allocation5 + $0x38] sm:$0xff]   ;;  %v2989_v2 = vld [vmem:[#allocation5 + $0x30] sm:$0xff]   ;;  %v2990_v3 = vld [vmem:[#allocation5 + $0x28] sm:$0xff]   ;;  %s2562_s15 = sshll.u32 %s3516_s18, 9  ;;  %s2768_s8 = sshll.u32 %s3422_s13, 13 }
  0x4e   : > { %3355 = vsyncadd (%p4213_p8), [#allocation6], 4294962176  ;;  %1525 = vmatprep.subr.bf16.mxu0 %v3382_v0  ;;  %2889 = vmatprep.subr.bf16.mxu1 %v3382_v0  ;;  %v2991_v4 = vld [vmem:[#allocation5 + $0x20] sm:$0xff]   ;;  %v2992_v5 = vld [vmem:[#allocation5 + $0x18] sm:$0xff]   ;;  %s3965_s17 = scalar_lea.vmem [#allocation7], %s2562_s15  ;;  %s4150_s25 = scalar_lea.hbm %s4198_s2, %s2768_s8 }
  0x4f   : > { %1526 = vmatpush1.bf16.msra.mxu0 %v2988_v1  ;;  %2905 = vmatpush1.bf16.msra.mxu1 %v2988_v1  ;;  %v3006_v6 = vld [vmem:[%s3520_s24 + $0x4] ss:$20 sps:$4 sm:$0xff]   ;;  %v2993_v7 = vld [vmem:[#allocation5 + $0x10] sm:$0xff]   ;;  %v2994_v9 = vld [vmem:[#allocation5 + $0x8] sm:$0xff]   ;;  %s2470_s14 = sshll.u32 %s3965_s17, 4  ;;  %s2457_s13 = scalar_lea.sflag [#allocation4], %s3516_s18  ;;  %s4152_s14 = int_to_ptr.vmem [resolvable:$true] %s2470_s14 }
  0x50   : > { %1527 = vmatprep.subr.bf16.mxu0 %v3382_v0  ;;  %2890 = vmatprep.subr.bf16.mxu1 %v3382_v0  ;;  %v3009_v8 = vld [vmem:[%s3520_s24 + $0x3c4] ss:$20 sps:$4 sm:$0xff]   ;;  %v2997_v12 = vld [vmem:[#allocation5 + $0x70] sm:$0xff]   ;;  %v2998_v13 = vld [vmem:[#allocation5 + $0x68] sm:$0xff]   ;;  %s3306_s26 = scalar_lea.vmem %s4152_s14, 8192  ;;  %p4238_p10 = scmp.ne.s32.totalorder %s4208_s30, 0 }
  0x51   : > { %1557 = vmatprep.mubr.bf16.mxu0 %v3006_v6  ;;  %1749 = vmatprep.mubr.bf16.mxu1 %v3009_v8  ;;  %v2995_v10 = vld [vmem:[#allocation5] sm:$0xff]   ;;  %v2996_v11 = vld [vmem:[#allocation5 + $0x78] sm:$0xff]   ;;  %v3001_v16 = vld [vmem:[#allocation5 + $0x50] sm:$0xff]   ;;  %p3307_p3 = scmp.ne.s32.totalorder %s4152_s14, %s3306_s26  ;;  %s3383_s27 = smov [#allocation7]  }
  0x52   : > { %v2999_v14 = vld [vmem:[#allocation5 + $0x60] sm:$0xff]   ;;  %v3000_v15 = vld [vmem:[#allocation5 + $0x58] sm:$0xff]   ;;  %v3002_v17 = vld [vmem:[#allocation5 + $0x48] sm:$0xff]   ;;  %s3310_s28 = sshll.u32 %s3383_s27, 4  ;;  %s3311_s28 = int_to_ptr.vmem [resolvable:$false] %s3310_s28 }
  0x53   : > { %1528 = vmatpush1.bf16.msra.mxu0 %v2989_v2  ;;  %2906 = vmatpush1.bf16.msra.mxu1 %v2989_v2  ;;  %v3003_v18 = vld [vmem:[#allocation5 + $0x40] sm:$0xff]   ;;  %v3010_v19 = vld [vmem:[#allocation5 + $0x138] sm:$0xff]   ;;  %v3035_v25 = vld [vmem:[#allocation5 + $0x130] sm:$0xff]   ;;  %p3308_p7 = pnand %p3307_p3, %p4238_p10  ;;  %s3312_s3 = scalar_lea.vmem %s3311_s28, 16384 }
  0x54   : > { %1529 = vmatprep.subr.bf16.mxu0 %v3382_v0  ;;  %2891 = vmatprep.subr.bf16.mxu1 %v3382_v0  ;;  %v3004_v20 = vld [vmem:[%s3520_s24] ss:$20 sps:$4 sm:$0xff]   ;;  %v3011_v22 = vld [vmem:[#allocation5 + $0xb8] sm:$0xff]   ;;  %v3060_v27 = vld [vmem:[#allocation5 + $0x128] sm:$0xff]   ;;  %p3313_p12 = scmp.lt.s32.totalorder %s4152_s14, %s3311_s28  ;;  %p3314_p2 = scmp.lt.s32.totalorder %s3312_s3, %s3306_s26 }
  0x55   : > { %v3007_v21 = vld [vmem:[%s3520_s24 + $0x3c0] ss:$20 sps:$4 sm:$0xff]   ;;  %v3017_v28 = vld [vmem:[%s3520_s24 + $0x28] ss:$20 sps:$4 sm:$0xff]   ;;  %v3025_v35 = vld [vmem:[%s3520_s24 + $0x50] ss:$20 sps:$4 sm:$0xff]   ;;  %p3309_p11 = pneg %p3308_p7 }
  0x56   : > { %v3013_v23 = vld [vmem:[%s3520_s24 + $0x2c] ss:$20 sps:$4 sm:$0xff]   ;;  %v3012_v26 = vld [vmem:[#allocation5 + $0xb0] sm:$0xff]   ;;  %v3018_v29 = vld [vmem:[%s3520_s24 + $0x3e8] ss:$20 sps:$4 sm:$0xff]   ;;  %p3315_p13 = por %p3314_p2, %p3313_p12 }
  0x57   : > { %1530 = vmatpush1.bf16.msra.mxu0 %v2990_v3  ;;  %2907 = vmatpush1.bf16.msra.mxu1 %v2990_v3  ;;  %v3015_v24 = vld [vmem:[%s3520_s24 + $0x3ec] ss:$20 sps:$4 sm:$0xff]   ;;  %v3021_v31 = vld [vmem:[%s3520_s24 + $0x54] ss:$20 sps:$4 sm:$0xff]   ;;  %v3026_v36 = vld [vmem:[%s3520_s24 + $0x410] ss:$20 sps:$4 sm:$0xff]  }
  0x58   : > { %1531 = vmatprep.subr.bf16.mxu0 %v3382_v0  ;;  %2892 = vmatprep.subr.bf16.mxu1 %v3382_v0  ;;  %v3019_v30 = vld [vmem:[#allocation5 + $0xa8] sm:$0xff]   ;;  %v3083_v33 = vld [vmem:[#allocation5 + $0x120] sm:$0xff]   ;;  %v3027_v37 = vld [vmem:[#allocation5 + $0x98] sm:$0xff]   ;;  %p3316_p0 = pnand %p3315_p13, %p3309_p11 }
  0x59   : > { %v3023_v32 = vld [vmem:[%s3520_s24 + $0x414] ss:$20 sps:$4 sm:$0xff]   ;;  %v3020_v34 = vld [vmem:[#allocation5 + $0xa0] sm:$0xff]   ;;  %v3029_v38 = vld [vmem:[%s3520_s24 + $0x7c] ss:$20 sps:$4 sm:$0xff]  }
  0x5a   : > { %v3031_v39 = vld [vmem:[%s3520_s24 + $0x43c] ss:$20 sps:$4 sm:$0xff]   ;;  %v3033_v43 = vld [vmem:[%s3520_s24 + $0x78] ss:$20 sps:$4 sm:$0xff]   ;;  %v3037_v49 = vld [vmem:[#allocation5 + $0x80] sm:$0xff]  }
  0x5b   : > { %1532 = vmatpush1.bf16.msra.mxu0 %v2991_v4  ;;  %2908 = vmatpush1.bf16.msra.mxu1 %v2991_v4  ;;  %v3102_v40 = vld [vmem:[#allocation5 + $0x118] sm:$0xff]   ;;  %v3028_v41 = vld [vmem:[#allocation5 + $0x90] sm:$0xff]   ;;  %v3036_v45 = vld [vmem:[#allocation5 + $0x88] sm:$0xff]  }
  0x5c   : > { %1533 = vmatprep.subr.bf16.mxu0 %v3382_v0  ;;  %2893 = vmatprep.subr.bf16.mxu1 %v3382_v0  ;;  %v3121_v42 = vld [vmem:[#allocation5 + $0x110] sm:$0xff]   ;;  %v3034_v44 = vld [vmem:[%s3520_s24 + $0x438] ss:$20 sps:$4 sm:$0xff]   ;;  %v3050_v56 = vld [vmem:[%s3520_s24 + $0xc8] ss:$20 sps:$4 sm:$0xff]  }
  0x5d   : > { %v3038_v46 = vld [vmem:[%s3520_s24 + $0xa4] ss:$20 sps:$4 sm:$0xff]   ;;  %v3140_v48 = vld [vmem:[#allocation5 + $0x108] sm:$0xff]   ;;  %v3042_v50 = vld [vmem:[%s3520_s24 + $0xa0] ss:$20 sps:$4 sm:$0xff]  }
  0x5e   : > { %v3040_v47 = vld [vmem:[%s3520_s24 + $0x464] ss:$20 sps:$4 sm:$0xff]   ;;  %v3043_v51 = vld [vmem:[%s3520_s24 + $0x460] ss:$20 sps:$4 sm:$0xff]   ;;  %v3051_v57 = vld [vmem:[%s3520_s24 + $0x488] ss:$20 sps:$4 sm:$0xff]  }
  0x5f   : > { %1534 = vmatpush1.bf16.msra.mxu0 %v2992_v5  ;;  %2909 = vmatpush1.bf16.msra.mxu1 %v2992_v5  ;;  %v3044_v52 = vld [vmem:[#allocation5 + $0xf8] sm:$0xff]   ;;  %v3046_v53 = vld [vmem:[%s3520_s24 + $0xcc] ss:$20 sps:$4 sm:$0xff]   ;;  %v3045_v55 = vld [vmem:[#allocation5 + $0xf0] sm:$0xff]  }
  0x60   : > { %1535 = vmatprep.subr.bf16.mxu0 %v3382_v0  ;;  %2894 = vmatprep.subr.bf16.mxu1 %v3382_v0  ;;  %v3048_v54 = vld [vmem:[%s3520_s24 + $0x48c] ss:$20 sps:$4 sm:$0xff]   ;;  %v3054_v59 = vld [vmem:[%s3520_s24 + $0xf4] ss:$20 sps:$4 sm:$0xff]   ;;  %v3058_v63 = vld [vmem:[%s3520_s24 + $0xf0] ss:$20 sps:$4 sm:$0xff]  }
  0x61   : > { %v3052_v58 = vld [vmem:[#allocation5 + $0xe8] sm:$0xff]   ;;  %v3159_v61 = vld [vmem:[#allocation5 + $0x100] sm:$0xff]   ;;  %v3061_v2 = vld [vmem:[#allocation5 + $0xd8] sm:$0xff]  }
  0x62   : > { %v3056_v60 = vld [vmem:[%s3520_s24 + $0x4b4] ss:$20 sps:$4 sm:$0xff]   ;;  %v3053_v62 = vld [vmem:[#allocation5 + $0xe0] sm:$0xff]   ;;  %v3063_v3 = vld [vmem:[%s3520_s24 + $0x11c] ss:$20 sps:$4 sm:$0xff]  }
  0x63   : > { %1536 = vmatpush1.bf16.msra.mxu0 %v2993_v7  ;;  %2910 = vmatpush1.bf16.msra.mxu1 %v2993_v7  ;;  %v3059_v1 = vld [vmem:[%s3520_s24 + $0x4b0] ss:$20 sps:$4 sm:$0xff]   ;;  %v3067_v6 = vld [vmem:[%s3520_s24 + $0x118] ss:$20 sps:$4 sm:$0xff]  }
  0x64   : > { %1537 = vmatprep.subr.bf16.mxu0 %v3382_v0  ;;  %2895 = vmatprep.subr.bf16.mxu1 %v3382_v0  ;;  %v3065_v4 = vld [vmem:[%s3520_s24 + $0x4dc] ss:$20 sps:$4 sm:$0xff]   ;;  %v3068_v7 = vld [vmem:[%s3520_s24 + $0x4d8] ss:$20 sps:$4 sm:$0xff]  }
  0x65   : > { %v3062_v5 = vld [vmem:[#allocation5 + $0xd0] sm:$0xff]   ;;  %v3069_v8 = vld [vmem:[#allocation5 + $0xc8] sm:$0xff]  }
  0x67   : > { %1538 = vmatpush1.bf16.msra.mxu0 %v2994_v9  ;;  %2911 = vmatpush1.bf16.msra.mxu1 %v2994_v9  ;;  %v3071_v9 = vld [vmem:[%s3520_s24 + $0x144] ss:$20 sps:$4 sm:$0xff]  }
  0x68   : > { %1539 = vmatprep.subr.bf16.mxu0 %v3382_v0  ;;  %2896 = vmatprep.subr.bf16.mxu1 %v3382_v0 }
  0x6b   : > { %1540 = vmatpush1.bf16.msra.mxu0 %v2995_v10  ;;  %2912 = vmatpush1.bf16.msra.mxu1 %v2995_v10  ;;  %v3075_v10 = vld [vmem:[%s3520_s24 + $0xc] ss:$20 sps:$4 sm:$0xff]  }
  0x6c   : > { %1541 = vmatprep.subr.bf16.mxu0 %v3382_v0  ;;  %2897 = vmatprep.subr.bf16.mxu1 %v3382_v0 }
  0x6f   : > { %1542 = vmatpush2.bf16.msra.mxu0 %v2996_v11  ;;  %2913 = vmatpush2.bf16.msra.mxu1 %v2996_v11  ;;  %v3070_v11 = vld [vmem:[#allocation5 + $0xc0] sm:$0xff]  }
  0x70   : > { %1543 = vmatprep.subr.bf16.mxu0 %v3382_v0  ;;  %2898 = vmatprep.subr.bf16.mxu1 %v3382_v0 }
  0x73   : > { %1544 = vmatpush2.bf16.msra.mxu0 %v2997_v12  ;;  %2914 = vmatpush2.bf16.msra.mxu1 %v2997_v12  ;;  %v3073_v12 = vld [vmem:[%s3520_s24 + $0x8] ss:$20 sps:$4 sm:$0xff]  }
  0x74   : > { %1545 = vmatprep.subr.bf16.mxu0 %v3382_v0  ;;  %2899 = vmatprep.subr.bf16.mxu1 %v3382_v0 }
  0x77   : > { %1546 = vmatpush2.bf16.msra.mxu0 %v2998_v13  ;;  %2915 = vmatpush2.bf16.msra.mxu1 %v2998_v13  ;;  %v3076_v13 = vld [vmem:[%s3520_s24 + $0x140] ss:$20 sps:$4 sm:$0xff]  }
  0x78   : > { %1547 = vmatprep.subr.bf16.mxu0 %v3382_v0  ;;  %2900 = vmatprep.subr.bf16.mxu1 %v3382_v0 }
  0x7b   : > { %1548 = vmatpush2.bf16.msra.mxu0 %v2999_v14  ;;  %2916 = vmatpush2.bf16.msra.mxu1 %v2999_v14  ;;  %v3077_v14 = vld [vmem:[%s3520_s24 + $0x16c] ss:$20 sps:$4 sm:$0xff]  }
  0x7c   : > { %1549 = vmatprep.subr.bf16.mxu0 %v3382_v0  ;;  %2901 = vmatprep.subr.bf16.mxu1 %v3382_v0 }
  0x7f   : > { %1550 = vmatpush2.bf16.msra.mxu0 %v3000_v15  ;;  %2917 = vmatpush2.bf16.msra.mxu1 %v3000_v15  ;;  %v3079_v15 = vld [vmem:[%s3520_s24 + $0x34] ss:$20 sps:$4 sm:$0xff]  }
  0x80   : > { %1551 = vmatprep.subr.bf16.mxu0 %v3382_v0  ;;  %2902 = vmatprep.subr.bf16.mxu1 %v3382_v0 }
  0x83   : > { %1552 = vmatpush2.bf16.msra.mxu0 %v3001_v16  ;;  %2918 = vmatpush2.bf16.msra.mxu1 %v3001_v16  ;;  %v3081_v16 = vld [vmem:[%s3520_s24 + $0x168] ss:$20 sps:$4 sm:$0xff]  }
  0x84   : > { %1553 = vmatprep.subr.bf16.mxu0 %v3382_v0  ;;  %2903 = vmatprep.subr.bf16.mxu1 %v3382_v0 }
  0x87   : > { %1554 = vmatpush2.bf16.msra.mxu0 %v3002_v17  ;;  %2919 = vmatpush2.bf16.msra.mxu1 %v3002_v17  ;;  %v3082_v17 = vld [vmem:[%s3520_s24 + $0x30] ss:$20 sps:$4 sm:$0xff]  }
  0x88   : > { %1555 = vmatprep.subr.bf16.mxu0 %v3382_v0  ;;  %2904 = vmatprep.subr.bf16.mxu1 %v3382_v0 }
  0x8b   : > { %1556 = vmatpush2.bf16.msra.mxu0 %v3003_v18  ;;  %2920 = vmatpush2.bf16.msra.mxu1 %v3003_v18  ;;  %v3084_v18 = vld [vmem:[%s3520_s24 + $0x194] ss:$20 sps:$4 sm:$0xff]  }
  0x8c   : > { %1814 = vmatprep.subr.bf16.mxu1 %v3382_v0  ;;  %2809 = vmatprep.subr.bf16.mxu0 %v3010_v19 }
  0x8e   : > { %1558 = vmatmul.mubr.bf16.vlgmr.msra.gmra.mxu0 %v3004_v20  ;;  %1750 = vmatmul.mubr.bf16.vlgmr.msra.gmra.mxu1 %v3007_v21  ;;  %v3089_v20 = vld [vmem:[%s3520_s24 + $0x58] ss:$20 sps:$4 sm:$0xff]   ;;  %v3090_v21 = vld [vmem:[%s3520_s24 + $0x1bc] ss:$20 sps:$4 sm:$0xff]  }
  0x8f   : > { %1815 = vmatpush1.bf16.msra.mxu1 %v3011_v22  ;;  %2810 = vmatpush3.bf16.msra.mxu0 %v3010_v19  ;;  %v3088_v19 = vld [vmem:[%s3520_s24 + $0x190] ss:$20 sps:$4 sm:$0xff]  }
  0x90   : > { %1816 = vmatprep.subr.bf16.mxu1 %v3382_v0  ;;  %1565 = vmatprep.mubr.bf16.mxu0 %v3013_v23  ;;  %v3092_v22 = vld [vmem:[%s3520_s24 + $0x84] ss:$20 sps:$4 sm:$0xff]  }
  0x91   : > { %1757 = vmatprep.mubr.bf16.mxu1 %v3015_v24  ;;  %2811 = vmatprep.subr.bf16.mxu0 %v3035_v25  ;;  %v3094_v23 = vld [vmem:[%s3520_s24 + $0x1b8] ss:$20 sps:$4 sm:$0xff]   ;;  %v3095_v24 = vld [vmem:[%s3520_s24 + $0x80] ss:$20 sps:$4 sm:$0xff]  }
  0x93   : > { %1817 = vmatpush1.bf16.msra.mxu1 %v3012_v26  ;;  %2812 = vmatpush3.bf16.msra.mxu0 %v3035_v25  ;;  %v3096_v25 = vld [vmem:[%s3520_s24 + $0x1e4] ss:$20 sps:$4 sm:$0xff]   ;;  %v3098_v26 = vld [vmem:[%s3520_s24 + $0xac] ss:$20 sps:$4 sm:$0xff]  }
  0x94   : > { %1818 = vmatprep.subr.bf16.mxu1 %v3382_v0  ;;  %2813 = vmatprep.subr.bf16.mxu0 %v3060_v27 }
  0x96   : > { %1566 = vmatmul.mubr.bf16.gmra.mxu0 %v3017_v28  ;;  %1758 = vmatmul.mubr.bf16.gmra.mxu1 %v3018_v29  ;;  %v3101_v28 = vld [vmem:[%s3520_s24 + $0xa8] ss:$20 sps:$4 sm:$0xff]   ;;  %v3103_v29 = vld [vmem:[%s3520_s24 + $0x20c] ss:$20 sps:$4 sm:$0xff]  }
  0x97   : > { %1819 = vmatpush1.bf16.msra.mxu1 %v3019_v30  ;;  %1573 = vmatprep.mubr.bf16.mxu0 %v3021_v31  ;;  %v3105_v30 = vld [vmem:[%s3520_s24 + $0xd4] ss:$20 sps:$4 sm:$0xff]  }
  0x98   : > { %1820 = vmatprep.subr.bf16.mxu1 %v3382_v0  ;;  %1765 = vmatprep.mubr.bf16.mxu1 %v3023_v32  ;;  %v3107_v31 = vld [vmem:[%s3520_s24 + $0x208] ss:$20 sps:$4 sm:$0xff]   ;;  %v3108_v32 = vld [vmem:[%s3520_s24 + $0xd0] ss:$20 sps:$4 sm:$0xff]  }
  0x99   : > { %2814 = vmatpush3.bf16.msra.mxu0 %v3060_v27  ;;  %v3100_v27 = vld [vmem:[%s3520_s24 + $0x1e0] ss:$20 sps:$4 sm:$0xff]  }
  0x9a   : > { %2815 = vmatprep.subr.bf16.mxu0 %v3083_v33 }
  0x9b   : > { %1821 = vmatpush1.bf16.msra.mxu1 %v3020_v34  ;;  %v3111_v34 = vld [vmem:[%s3520_s24 + $0xfc] ss:$20 sps:$4 sm:$0xff]  }
  0x9c   : > { %1822 = vmatprep.subr.bf16.mxu1 %v3382_v0 }
  0x9d   : > { %2816 = vmatpush3.bf16.msra.mxu0 %v3083_v33  ;;  %v3109_v33 = vld [vmem:[%s3520_s24 + $0x234] ss:$20 sps:$4 sm:$0xff]  }
  0x9e   : > { %1574 = vmatmul.mubr.bf16.gmra.mxu0 %v3025_v35  ;;  %1766 = vmatmul.mubr.bf16.gmra.mxu1 %v3026_v36  ;;  %v3113_v35 = vld [vmem:[%s3520_s24 + $0x230] ss:$20 sps:$4 sm:$0xff]   ;;  %v3114_v36 = vld [vmem:[%s3520_s24 + $0xf8] ss:$20 sps:$4 sm:$0xff]  }
  0x9f   : > { %1823 = vmatpush1.bf16.msra.mxu1 %v3027_v37  ;;  %1581 = vmatprep.mubr.bf16.mxu0 %v3029_v38  ;;  %v3115_v37 = vld [vmem:[%s3520_s24 + $0x25c] ss:$20 sps:$4 sm:$0xff]   ;;  %v3117_v38 = vld [vmem:[%s3520_s24 + $0x124] ss:$20 sps:$4 sm:$0xff]  }
  0xa0   : > { %1824 = vmatprep.subr.bf16.mxu1 %v3382_v0  ;;  %1773 = vmatprep.mubr.bf16.mxu1 %v3031_v39  ;;  %v3119_v39 = vld [vmem:[%s3520_s24 + $0x258] ss:$20 sps:$4 sm:$0xff]  }
  0xa1   : > { %2817 = vmatprep.subr.bf16.mxu0 %v3102_v40 }
  0xa2   : > { %2818 = vmatpush3.bf16.msra.mxu0 %v3102_v40  ;;  %v3120_v40 = vld [vmem:[%s3520_s24 + $0x120] ss:$20 sps:$4 sm:$0xff]  }
  0xa3   : > { %1825 = vmatpush1.bf16.msra.mxu1 %v3028_v41  ;;  %2819 = vmatprep.subr.bf16.mxu0 %v3121_v42  ;;  %v3122_v41 = vld [vmem:[%s3520_s24 + $0x284] ss:$20 sps:$4 sm:$0xff]  }
  0xa4   : > { %1826 = vmatprep.subr.bf16.mxu1 %v3382_v0 }
  0xa6   : > { %1582 = vmatmul.mubr.bf16.gmra.mxu0 %v3033_v43  ;;  %1774 = vmatmul.mubr.bf16.gmra.mxu1 %v3034_v44  ;;  %v3126_v43 = vld [vmem:[%s3520_s24 + $0x280] ss:$20 sps:$4 sm:$0xff]   ;;  %v3127_v44 = vld [vmem:[%s3520_s24 + $0x148] ss:$20 sps:$4 sm:$0xff]  }
  0xa7   : > { %1827 = vmatpush1.bf16.msra.mxu1 %v3036_v45  ;;  %1589 = vmatprep.mubr.bf16.mxu0 %v3038_v46  ;;  %v3128_v45 = vld [vmem:[%s3520_s24 + $0x2ac] ss:$20 sps:$4 sm:$0xff]   ;;  %v3130_v46 = vld [vmem:[%s3520_s24 + $0x174] ss:$20 sps:$4 sm:$0xff]  }
  0xa8   : > { %1828 = vmatprep.subr.bf16.mxu1 %v3382_v0  ;;  %1781 = vmatprep.mubr.bf16.mxu1 %v3040_v47  ;;  %v3132_v47 = vld [vmem:[%s3520_s24 + $0x2a8] ss:$20 sps:$4 sm:$0xff]  }
  0xa9   : > { %2820 = vmatpush3.bf16.msra.mxu0 %v3121_v42  ;;  %v3124_v42 = vld [vmem:[%s3520_s24 + $0x14c] ss:$20 sps:$4 sm:$0xff]  }
  0xaa   : > { %2821 = vmatprep.subr.bf16.mxu0 %v3140_v48 }
  0xab   : > { %1829 = vmatpush1.bf16.msra.mxu1 %v3037_v49  ;;  %v3134_v49 = vld [vmem:[%s3520_s24 + $0x2d4] ss:$20 sps:$4 sm:$0xff]  }
  0xac   : > { %1830 = vmatprep.subr.bf16.mxu1 %v3382_v0 }
  0xad   : > { %2822 = vmatpush3.bf16.msra.mxu0 %v3140_v48  ;;  %v3133_v48 = vld [vmem:[%s3520_s24 + $0x170] ss:$20 sps:$4 sm:$0xff]  }
  0xae   : > { %1590 = vmatmul.mubr.bf16.gmra.mxu0 %v3042_v50  ;;  %1782 = vmatmul.mubr.bf16.gmra.mxu1 %v3043_v51  ;;  %v3136_v50 = vld [vmem:[%s3520_s24 + $0x19c] ss:$20 sps:$4 sm:$0xff]  }
  0xaf   : > { %1831 = vmatpush2.bf16.msra.mxu1 %v3044_v52  ;;  %1597 = vmatprep.mubr.bf16.mxu0 %v3046_v53  ;;  %v3138_v51 = vld [vmem:[%s3520_s24 + $0x2d0] ss:$20 sps:$4 sm:$0xff]   ;;  %v3139_v52 = vld [vmem:[%s3520_s24 + $0x198] ss:$20 sps:$4 sm:$0xff]  }
  0xb0   : > { %1832 = vmatprep.subr.bf16.mxu1 %v3382_v0  ;;  %1789 = vmatprep.mubr.bf16.mxu1 %v3048_v54  ;;  %v3141_v53 = vld [vmem:[%s3520_s24 + $0x2fc] ss:$20 sps:$4 sm:$0xff]   ;;  %v3143_v54 = vld [vmem:[%s3520_s24 + $0x1c4] ss:$20 sps:$4 sm:$0xff]  }
  0xb1   : > { %2823 = vmatprep.subr.bf16.mxu0 %v3159_v61 }
  0xb2   : > { %2824 = vmatpush3.bf16.msra.mxu0 %v3159_v61  ;;  %v3153_v61 = vld [vmem:[%s3520_s24 + $0x34c] ss:$20 sps:$4 sm:$0xff]  }
  0xb3   : > { %1833 = vmatpush2.bf16.msra.mxu1 %v3045_v55  ;;  %v3145_v55 = vld [vmem:[%s3520_s24 + $0x2f8] ss:$20 sps:$4 sm:$0xff]  }
  0xb4   : > { %1834 = vmatprep.subr.bf16.mxu1 %v3382_v0 }
  0xb6   : > { %1598 = vmatmul.mubr.bf16.gmra.mxu0 %v3050_v56  ;;  %1790 = vmatmul.mubr.bf16.gmra.mxu1 %v3051_v57  ;;  %v3146_v56 = vld [vmem:[%s3520_s24 + $0x1c0] ss:$20 sps:$4 sm:$0xff]   ;;  %v3147_v57 = vld [vmem:[%s3520_s24 + $0x324] ss:$20 sps:$4 sm:$0xff]  }
  0xb7   : > { %1835 = vmatpush2.bf16.msra.mxu1 %v3052_v58  ;;  %1605 = vmatprep.mubr.bf16.mxu0 %v3054_v59  ;;  %v3149_v58 = vld [vmem:[%s3520_s24 + $0x1ec] ss:$20 sps:$4 sm:$0xff]  }
  0xb8   : > { %1836 = vmatprep.subr.bf16.mxu1 %v3382_v0  ;;  %1797 = vmatprep.mubr.bf16.mxu1 %v3056_v60  ;;  %v3151_v59 = vld [vmem:[%s3520_s24 + $0x320] ss:$20 sps:$4 sm:$0xff]   ;;  %v3152_v60 = vld [vmem:[%s3520_s24 + $0x1e8] ss:$20 sps:$4 sm:$0xff]  }
  0xbb   : > { %1837 = vmatpush2.bf16.msra.mxu1 %v3053_v62  ;;  %v3155_v62 = vld [vmem:[%s3520_s24 + $0x214] ss:$20 sps:$4 sm:$0xff]  }
  0xbc   : > { %1838 = vmatprep.subr.bf16.mxu1 %v3382_v0 }
  0xbe   : > { %1606 = vmatmul.mubr.bf16.gmra.mxu0 %v3058_v63  ;;  %1798 = vmatmul.mubr.bf16.gmra.mxu1 %v3059_v1  ;;  %v3157_v63 = vld [vmem:[%s3520_s24 + $0x348] ss:$20 sps:$4 sm:$0xff]   ;;  %v3158_v1 = vld [vmem:[%s3520_s24 + $0x210] ss:$20 sps:$4 sm:$0xff]  }
  0xbf   : > { %1839 = vmatpush2.bf16.msra.mxu1 %v3061_v2  ;;  %1613 = vmatprep.mubr.bf16.mxu0 %v3063_v3  ;;  %v3160_v2 = vld [vmem:[%s3520_s24 + $0x374] ss:$20 sps:$4 sm:$0xff]   ;;  %v3162_v3 = vld [vmem:[%s3520_s24 + $0x23c] ss:$20 sps:$4 sm:$0xff]  }
  0xc0   : > { %1840 = vmatprep.subr.bf16.mxu1 %v3382_v0  ;;  %1805 = vmatprep.mubr.bf16.mxu1 %v3065_v4  ;;  %v3164_v4 = vld [vmem:[%s3520_s24 + $0x370] ss:$20 sps:$4 sm:$0xff]  }
  0xc3   : > { %1841 = vmatpush2.bf16.msra.mxu1 %v3062_v5  ;;  %v3165_v5 = vld [vmem:[%s3520_s24 + $0x238] ss:$20 sps:$4 sm:$0xff]  }
  0xc4   : > { %1842 = vmatprep.subr.bf16.mxu1 %v3382_v0 }
  0xc6   : > { %1614 = vmatmul.mubr.bf16.gmra.mxu0 %v3067_v6  ;;  %1806 = vmatmul.mubr.bf16.gmra.mxu1 %v3068_v7  ;;  %v3166_v6 = vld [vmem:[%s3520_s24 + $0x39c] ss:$20 sps:$4 sm:$0xff]   ;;  %v3168_v7 = vld [vmem:[%s3520_s24 + $0x264] ss:$20 sps:$4 sm:$0xff]  }
  0xc7   : > { %1843 = vmatpush2.bf16.msra.mxu1 %v3069_v8  ;;  %1621 = vmatprep.mubr.bf16.mxu0 %v3071_v9  ;;  %v3170_v8 = vld [vmem:[%s3520_s24 + $0x398] ss:$20 sps:$4 sm:$0xff]   ;;  %v3171_v9 = vld [vmem:[%s3520_s24 + $0x260] ss:$20 sps:$4 sm:$0xff]  }
  0xc8   : > { %1844 = vmatprep.subr.bf16.mxu1 %v3382_v0  ;;  %1846 = vmatprep.mubr.bf16.mxu1 %v3075_v10  ;;  %v3086_v0 = vld [vmem:[%s3520_s24 + $0x5c] ss:$20 sps:$4 sm:$0xff]   ;;  %v3172_v10 = vld [vmem:[%s3520_s24 + $0x28c] ss:$20 sps:$4 sm:$0xff]  }
  0xcb   : > { %1845 = vmatpush2.bf16.msra.mxu1 %v3070_v11  ;;  %v3174_v11 = vld [vmem:[%s3520_s24 + $0x10] ss:$20 sps:$4 sm:$0xff]  }
  0xce   : > { %1622 = vmatmul.mubr.bf16.gmra.mxu0 %v3076_v13  ;;  %1847 = vmatmul.mubr.bf16.vlgmr.msra.gmra.mxu1 %v3073_v12  ;;  %v3175_v12 = vld [vmem:[%s3520_s24 + $0x288] ss:$20 sps:$4 sm:$0xff]   ;;  %v3176_v13 = vld [vmem:[%s3520_s24 + $0x38] ss:$20 sps:$4 sm:$0xff]  }
  0xcf   : > { %1629 = vmatprep.mubr.bf16.mxu0 %v3077_v14  ;;  %1854 = vmatprep.mubr.bf16.mxu1 %v3079_v15  ;;  %v3177_v14 = vld [vmem:[%s3520_s24 + $0x2b4] ss:$20 sps:$4 sm:$0xff]  }
  0xd0   : > { %v3179_v15 = vld [vmem:[%s3520_s24 + $0x60] ss:$20 sps:$4 sm:$0xff]  }
  0xd6   : > { %1630 = vmatmul.mubr.bf16.gmra.mxu0 %v3081_v16  ;;  %1855 = vmatmul.mubr.bf16.gmra.mxu1 %v3082_v17 }
  0xd7   : > { %1637 = vmatprep.mubr.bf16.mxu0 %v3084_v18  ;;  %1862 = vmatprep.mubr.bf16.mxu1 %v3086_v0 }
  0xde   : > { %1638 = vmatmul.mubr.bf16.gmra.mxu0 %v3088_v19  ;;  %1863 = vmatmul.mubr.bf16.gmra.mxu1 %v3089_v20 }
  0xdf   : > { %1645 = vmatprep.mubr.bf16.mxu0 %v3090_v21  ;;  %1870 = vmatprep.mubr.bf16.mxu1 %v3092_v22  ;;  %v3180_v21 = vld [vmem:[%s3520_s24 + $0x2b0] ss:$20 sps:$4 sm:$0xff]   ;;  %v3181_v22 = vld [vmem:[%s3520_s24 + $0x88] ss:$20 sps:$4 sm:$0xff]  }
  0xe6   : > { %1646 = vmatmul.mubr.bf16.gmra.mxu0 %v3094_v23  ;;  %1871 = vmatmul.mubr.bf16.gmra.mxu1 %v3095_v24  ;;  %v3182_v23 = vld [vmem:[%s3520_s24 + $0x2dc] ss:$20 sps:$4 sm:$0xff]  }
  0xe7   : > { %1653 = vmatprep.mubr.bf16.mxu0 %v3096_v25  ;;  %1878 = vmatprep.mubr.bf16.mxu1 %v3098_v26  ;;  %v3184_v24 = vld [vmem:[%s3520_s24 + $0xb0] ss:$20 sps:$4 sm:$0xff]  }
  0xee   : > { %1654 = vmatmul.mubr.bf16.gmra.mxu0 %v3100_v27  ;;  %1879 = vmatmul.mubr.bf16.gmra.mxu1 %v3101_v28 }
  0xef   : > { %1661 = vmatprep.mubr.bf16.mxu0 %v3103_v29  ;;  %1886 = vmatprep.mubr.bf16.mxu1 %v3105_v30 }
  0xf6   : > { %1662 = vmatmul.mubr.bf16.gmra.mxu0 %v3107_v31  ;;  %1887 = vmatmul.mubr.bf16.gmra.mxu1 %v3108_v32 }
  0xf7   : > { %1669 = vmatprep.mubr.bf16.mxu0 %v3109_v33  ;;  %1894 = vmatprep.mubr.bf16.mxu1 %v3111_v34  ;;  %v3185_v33 = vld [vmem:[%s3520_s24 + $0x2d8] ss:$20 sps:$4 sm:$0xff]  }
  0xf8   : > { %v3186_v34 = vld [vmem:[%s3520_s24 + $0xd8] ss:$20 sps:$4 sm:$0xff]  }
  0xfe   : > { %1670 = vmatmul.mubr.bf16.gmra.mxu0 %v3113_v35  ;;  %1895 = vmatmul.mubr.bf16.gmra.mxu1 %v3114_v36  ;;  %v3187_v35 = vld [vmem:[%s3520_s24 + $0x304] ss:$20 sps:$4 sm:$0xff]   ;;  %v3189_v36 = vld [vmem:[%s3520_s24 + $0x100] ss:$20 sps:$4 sm:$0xff]  }
  0xff   : > { %1677 = vmatprep.mubr.bf16.mxu0 %v3115_v37  ;;  %1902 = vmatprep.mubr.bf16.mxu1 %v3117_v38 }
 0x106   : > { %1678 = vmatmul.mubr.bf16.gmra.mxu0 %v3119_v39  ;;  %1903 = vmatmul.mubr.bf16.gmra.mxu1 %v3120_v40 }
 0x107   : > { %1685 = vmatprep.mubr.bf16.mxu0 %v3122_v41  ;;  %1910 = vmatprep.mubr.bf16.mxu1 %v3124_v42 }
 0x10e   : > { %1686 = vmatmul.mubr.bf16.gmra.mxu0 %v3126_v43  ;;  %1911 = vmatmul.mubr.bf16.gmra.mxu1 %v3127_v44 }
 0x10f   : > { %1693 = vmatprep.mubr.bf16.mxu0 %v3128_v45  ;;  %1918 = vmatprep.mubr.bf16.mxu1 %v3130_v46  ;;  %v3190_v45 = vld [vmem:[%s3520_s24 + $0x300] ss:$20 sps:$4 sm:$0xff]   ;;  %v3191_v46 = vld [vmem:[%s3520_s24 + $0x128] ss:$20 sps:$4 sm:$0xff]  }
 0x116   : > { %1694 = vmatmul.mubr.bf16.gmra.mxu0 %v3132_v47  ;;  %1919 = vmatmul.mubr.bf16.gmra.mxu1 %v3133_v48  ;;  %v3194_v47 = vld [vmem:[%s3520_s24 + $0x32c] ss:$20 sps:$4 sm:$0xff]   ;;  %v3195_v48 = vld [vmem:[%s3520_s24 + $0x150] ss:$20 sps:$4 sm:$0xff]  }
 0x117   : > { %1701 = vmatprep.mubr.bf16.mxu0 %v3134_v49  ;;  %1926 = vmatprep.mubr.bf16.mxu1 %v3136_v50 }
 0x11e   : > { %1702 = vmatmul.mubr.bf16.gmra.mxu0 %v3138_v51  ;;  %1927 = vmatmul.mubr.bf16.gmra.mxu1 %v3139_v52 }
 0x11f   : > { %1709 = vmatprep.mubr.bf16.mxu0 %v3141_v53  ;;  %1934 = vmatprep.mubr.bf16.mxu1 %v3143_v54 }
 0x126   : > { %1710 = vmatmul.mubr.bf16.gmra.mxu0 %v3145_v55  ;;  %1935 = vmatmul.mubr.bf16.gmra.mxu1 %v3146_v56 }
 0x127   : > { %1717 = vmatprep.mubr.bf16.mxu0 %v3147_v57  ;;  %1942 = vmatprep.mubr.bf16.mxu1 %v3149_v58  ;;  %v3192_v57 = vld [vmem:[%s3520_s24 + $0x328] ss:$20 sps:$4 sm:$0xff]   ;;  %v3196_v58 = vld [vmem:[%s3520_s24 + $0x178] ss:$20 sps:$4 sm:$0xff]  }
 0x12e   : > { %1718 = vmatmul.mubr.bf16.gmra.mxu0 %v3151_v59  ;;  %1943 = vmatmul.mubr.bf16.gmra.mxu1 %v3152_v60  ;;  %v3199_v59 = vld [vmem:[%s3520_s24 + $0x354] ss:$20 sps:$4 sm:$0xff]  }
 0x12f   : > { %1725 = vmatprep.mubr.bf16.mxu0 %v3153_v61  ;;  %1950 = vmatprep.mubr.bf16.mxu1 %v3155_v62  ;;  %v3200_v60 = vld [vmem:[%s3520_s24 + $0x1a0] ss:$20 sps:$4 sm:$0xff]  }
 0x136   : > { %1726 = vmatmul.mubr.bf16.gmra.mxu0 %v3157_v63  ;;  %1951 = vmatmul.mubr.bf16.gmra.mxu1 %v3158_v1 }
 0x137   : > { %1733 = vmatprep.mubr.bf16.mxu0 %v3160_v2  ;;  %1958 = vmatprep.mubr.bf16.mxu1 %v3162_v3 }
 0x13e   : > { %1734 = vmatmul.mubr.bf16.gmra.mxu0 %v3164_v4  ;;  %1959 = vmatmul.mubr.bf16.gmra.mxu1 %v3165_v5 }
 0x13f   : > { %1741 = vmatprep.mubr.bf16.mxu0 %v3166_v6  ;;  %1966 = vmatprep.mubr.bf16.mxu1 %v3168_v7  ;;  %v3197_v6 = vld [vmem:[%s3520_s24 + $0x350] ss:$20 sps:$4 sm:$0xff]   ;;  %v3201_v7 = vld [vmem:[%s3520_s24 + $0x1c8] ss:$20 sps:$4 sm:$0xff]  }
 0x146   : > { %1742 = vmatmul.mubr.bf16.gmra.mxu0 %v3170_v8  ;;  %1967 = vmatmul.mubr.bf16.gmra.mxu1 %v3171_v9  ;;  %v3204_v8 = vld [vmem:[%s3520_s24 + $0x37c] ss:$20 sps:$4 sm:$0xff]  }
 0x147   : > { %1974 = vmatprep.mubr.bf16.mxu1 %v3172_v10  ;;  %2825 = vmatprep.mubr.bf16.mxu0 %v3174_v11  ;;  %v3205_v9 = vld [vmem:[%s3520_s24 + $0x1f0] ss:$20 sps:$4 sm:$0xff]  }
 0x14e   : > { %v3680_v16 = vpop.f32.mrf.mxu0  ;;  %v3682_v17 = vpop.f32.mrf.mxu1  ;;  %1975 = vmatmul.mubr.bf16.gmra.mxu1 %v3175_v12  ;;  %2826 = vmatmul.mubr.bf16.vlgmr.msra.gmra.mxu0 %v3176_v13 }
 0x14f   : > { %1982 = vmatprep.mubr.bf16.mxu1 %v3177_v14  ;;  %2829 = vmatprep.mubr.bf16.mxu0 %v3179_v15 }
 0x150   : > { %v1561_v18 = vpop.f32.mrf.mxu0  ;;  %v1753_v0 = vpop.f32.mrf.mxu1 }
 0x152   : > { %v3684_v19 = vpop.f32.mrf.mxu0  ;;  %v3686_v20 = vpop.f32.mrf.mxu1 }
 0x154   : > { %v1564_v25 = vpop.f32.mrf.mxu0  ;;  %v1756_v26 = vpop.f32.mrf.mxu1 }
 0x156   : > { %v3692_v27 = vpop.f32.mrf.mxu0  ;;  %v3694_v28 = vpop.f32.mrf.mxu1  ;;  %1983 = vmatmul.mubr.bf16.gmra.mxu1 %v3180_v21  ;;  %2830 = vmatmul.mubr.bf16.gmra.mxu0 %v3181_v22  ;;  %v3202_v21 = vld [vmem:[%s3520_s24 + $0x378] ss:$20 sps:$4 sm:$0xff]  }
 0x157   : > { %1990 = vmatprep.mubr.bf16.mxu1 %v3182_v23  ;;  %2833 = vmatprep.mubr.bf16.mxu0 %v3184_v24  ;;  %v3206_v22 = vld [vmem:[%s3520_s24 + $0x218] ss:$20 sps:$4 sm:$0xff]   ;;  %v3210_v24 = vld [vmem:[%s3520_s24 + $0x240] ss:$20 sps:$4 sm:$0xff]  }
 0x158   : > { %v1569_v29 = vpop.f32.mrf.mxu0  ;;  %v1761_v30 = vpop.f32.mrf.mxu1  ;;  %v3209_v23 = vld [vmem:[%s3520_s24 + $0x3a4] ss:$20 sps:$4 sm:$0xff]  }
 0x15a   : > { %v3696_v31 = vpop.f32.mrf.mxu0  ;;  %v3698_v32 = vpop.f32.mrf.mxu1 }
 0x15c   : > { %v1572_v37 = vpop.f32.mrf.mxu0  ;;  %v1764_v38 = vpop.f32.mrf.mxu1 }
 0x15d   : > { %v3207_v37 = vld [vmem:[%s3520_s24 + $0x3a0] ss:$20 sps:$4 sm:$0xff]   ;;  %v3211_v38 = vld [vmem:[%s3520_s24 + $0x268] ss:$20 sps:$4 sm:$0xff]  }
 0x15e   : > { %v3704_v39 = vpop.f32.mrf.mxu0  ;;  %v3706_v40 = vpop.f32.mrf.mxu1  ;;  %1991 = vmatmul.mubr.bf16.gmra.mxu1 %v3185_v33  ;;  %2834 = vmatmul.mubr.bf16.gmra.mxu0 %v3186_v34 }
 0x15f   : > { %4214 = vst [vmem:[#allocation11_spill] sm:$0xff] %v3706_v40  ;;  %1998 = vmatprep.mubr.bf16.mxu1 %v3187_v35  ;;  %2837 = vmatprep.mubr.bf16.mxu0 %v3189_v36 }
 0x160   : > { %v1577_v41 = vpop.f32.mrf.mxu0  ;;  %v1769_v42 = vpop.f32.mrf.mxu1 }
 0x161   : > { %v3214_v41 = vld [vmem:[%s3520_s24 + $0x3cc] ss:$20 sps:$4 sm:$0xff]   ;;  %v3215_v42 = vld [vmem:[%s3520_s24 + $0x290] ss:$20 sps:$4 sm:$0xff]  }
 0x162   : > { %v3708_v43 = vpop.f32.mrf.mxu0  ;;  %v3710_v44 = vpop.f32.mrf.mxu1 }
 0x163   : > { %4215 = vst [vmem:[#allocation12_spill] sm:$0xff] %v3710_v44 }
 0x164   : > { %v1580_v49 = vpop.f32.mrf.mxu0  ;;  %v1772_v50 = vpop.f32.mrf.mxu1 }
 0x166   : > { %v3716_v51 = vpop.f32.mrf.mxu0  ;;  %v3718_v52 = vpop.f32.mrf.mxu1  ;;  %1999 = vmatmul.mubr.bf16.gmra.mxu1 %v3190_v45  ;;  %2838 = vmatmul.mubr.bf16.gmra.mxu0 %v3191_v46 }
 0x167   : > { %4216 = vst [vmem:[#allocation13_spill] sm:$0xff] %v3718_v52  ;;  %2006 = vmatprep.mubr.bf16.mxu1 %v3194_v47  ;;  %2841 = vmatprep.mubr.bf16.mxu0 %v3195_v48 }
 0x168   : > { %v1585_v53 = vpop.f32.mrf.mxu0  ;;  %v1777_v54 = vpop.f32.mrf.mxu1 }
 0x16a   : > { %v3720_v55 = vpop.f32.mrf.mxu0  ;;  %v3722_v56 = vpop.f32.mrf.mxu1 }
 0x16b   : > { %4217 = vst [vmem:[#allocation14_spill] sm:$0xff] %v3722_v56 }
 0x16c   : > { %v1588_v61 = vpop.f32.mrf.mxu0  ;;  %v1780_v62 = vpop.f32.mrf.mxu1 }
 0x16e   : > { %v3728_v63 = vpop.f32.mrf.mxu0  ;;  %v3730_v1 = vpop.f32.mrf.mxu1  ;;  %2007 = vmatmul.mubr.bf16.gmra.mxu1 %v3192_v57  ;;  %2842 = vmatmul.mubr.bf16.gmra.mxu0 %v3196_v58  ;;  %v3212_v57 = vld [vmem:[%s3520_s24 + $0x3c8] ss:$20 sps:$4 sm:$0xff]   ;;  %v3216_v58 = vld [vmem:[%s3520_s24 + $0x2b8] ss:$20 sps:$4 sm:$0xff]  }
 0x16f   : > { %4218 = vst [vmem:[#allocation15_spill] sm:$0xff] %v3730_v1  ;;  %2014 = vmatprep.mubr.bf16.mxu1 %v3199_v59  ;;  %2845 = vmatprep.mubr.bf16.mxu0 %v3200_v60  ;;  %v3219_v59 = vld [vmem:[%s3520_s24 + $0x3f4] ss:$20 sps:$4 sm:$0xff]  }
 0x170   : > { %v1593_v2 = vpop.f32.mrf.mxu0  ;;  %v1785_v3 = vpop.f32.mrf.mxu1  ;;  %v3220_v60 = vld [vmem:[%s3520_s24 + $0x2e0] ss:$20 sps:$4 sm:$0xff]  }
 0x172   : > { %v3732_v4 = vpop.f32.mrf.mxu0  ;;  %v3734_v5 = vpop.f32.mrf.mxu1 }
 0x173   : > { %4219 = vst [vmem:[#allocation16_spill] sm:$0xff] %v3734_v5 }
 0x174   : > { %v1596_v10 = vpop.f32.mrf.mxu0  ;;  %v1788_v11 = vpop.f32.mrf.mxu1 }
 0x175   : > { %v3217_v11 = vld [vmem:[%s3520_s24 + $0x3f0] ss:$20 sps:$4 sm:$0xff]  }
 0x176   : > { %v3740_v12 = vpop.f32.mrf.mxu0  ;;  %v3742_v13 = vpop.f32.mrf.mxu1  ;;  %2015 = vmatmul.mubr.bf16.gmra.mxu1 %v3197_v6  ;;  %2846 = vmatmul.mubr.bf16.gmra.mxu0 %v3201_v7 }
 0x177   : > { %4220 = vst [vmem:[#allocation17_spill] sm:$0xff] %v3742_v13  ;;  %2022 = vmatprep.mubr.bf16.mxu1 %v3204_v8  ;;  %2849 = vmatprep.mubr.bf16.mxu0 %v3205_v9 }
 0x178   : > { %v1601_v14 = vpop.f32.mrf.mxu0  ;;  %v1793_v15 = vpop.f32.mrf.mxu1 }
 0x179   : > { %v3221_v14 = vld [vmem:[%s3520_s24 + $0x308] ss:$20 sps:$4 sm:$0xff]  }
 0x17a   : > { %v3744_v18 = vpop.f32.mrf.mxu0  ;;  %v3746_v0 = vpop.f32.mrf.mxu1 }
 0x17b   : > { %4221 = vst [vmem:[#allocation18_spill] sm:$0xff] %v3746_v0 }
 0x17c   : > { %v1604_v25 = vpop.f32.mrf.mxu0  ;;  %v1796_v26 = vpop.f32.mrf.mxu1 }
 0x17e   : > { %v3752_v29 = vpop.f32.mrf.mxu0  ;;  %v3754_v30 = vpop.f32.mrf.mxu1  ;;  %2023 = vmatmul.mubr.bf16.gmra.mxu1 %v3202_v21  ;;  %2850 = vmatmul.mubr.bf16.gmra.mxu0 %v3206_v22  ;;  %v3224_v21 = vld [vmem:[%s3520_s24 + $0x41c] ss:$20 sps:$4 sm:$0xff]  }
 0x17f   : > { %4222 = vst [vmem:[#allocation19_spill] sm:$0xff] %v3754_v30  ;;  %2030 = vmatprep.mubr.bf16.mxu1 %v3209_v23  ;;  %2853 = vmatprep.mubr.bf16.mxu0 %v3210_v24  ;;  %v3225_v22 = vld [vmem:[%s3520_s24 + $0x330] ss:$20 sps:$4 sm:$0xff]  }
 0x180   : > { %v1609_v33 = vpop.f32.mrf.mxu0  ;;  %v1801_v34 = vpop.f32.mrf.mxu1 }
 0x182   : > { %v3756_v35 = vpop.f32.mrf.mxu0  ;;  %v3758_v36 = vpop.f32.mrf.mxu1 }
 0x183   : > { %4223 = vst [vmem:[#allocation20_spill] sm:$0xff] %v3758_v36 }
 0x184   : > { %v1612_v45 = vpop.f32.mrf.mxu0  ;;  %v1804_v46 = vpop.f32.mrf.mxu1 }
 0x185   : > { %v3229_v45 = vld [vmem:[%s3520_s24 + $0x444] ss:$20 sps:$4 sm:$0xff]   ;;  %v3230_v46 = vld [vmem:[%s3520_s24 + $0x380] ss:$20 sps:$4 sm:$0xff]  }
 0x186   : > { %v3764_v47 = vpop.f32.mrf.mxu0  ;;  %v3766_v48 = vpop.f32.mrf.mxu1  ;;  %2031 = vmatmul.mubr.bf16.gmra.mxu1 %v3207_v37  ;;  %2854 = vmatmul.mubr.bf16.gmra.mxu0 %v3211_v38  ;;  %v3222_v38 = vld [vmem:[%s3520_s24 + $0x418] ss:$20 sps:$4 sm:$0xff]  }
 0x187   : > { %4224 = vst [vmem:[#allocation21_spill] sm:$0xff] %v3766_v48  ;;  %2038 = vmatprep.mubr.bf16.mxu1 %v3214_v41  ;;  %2857 = vmatprep.mubr.bf16.mxu0 %v3215_v42  ;;  %v3226_v41 = vld [vmem:[%s3520_s24 + $0x358] ss:$20 sps:$4 sm:$0xff]  }
 0x188   : > { %v1617_v49 = vpop.f32.mrf.mxu0  ;;  %v1809_v50 = vpop.f32.mrf.mxu1 }
 0x18a   : > { %v3768_v53 = vpop.f32.mrf.mxu0  ;;  %v3770_v54 = vpop.f32.mrf.mxu1 }
 0x18b   : > { %4225 = vst [vmem:[#allocation22_spill] sm:$0xff] %v3770_v54 }
 0x18c   : > { %v1620_v61 = vpop.f32.mrf.mxu0  ;;  %v1812_v62 = vpop.f32.mrf.mxu1 }
 0x18d   : > { %v3227_v62 = vld [vmem:[%s3520_s24 + $0x440] ss:$20 sps:$4 sm:$0xff]  }
 0x18e   : > { %v3776_v2 = vpop.f32.mrf.mxu0  ;;  %v1848_v3 = vpop.f32.mrf.mxu1  ;;  %2039 = vmatmul.mubr.bf16.gmra.mxu1 %v3212_v57  ;;  %2858 = vmatmul.mubr.bf16.gmra.mxu0 %v3216_v58 }
 0x18f   : > { %v3779_v6 = vadd.f32 %v1848_v3, %v3680_v16  ;;  %2046 = vmatprep.mubr.bf16.mxu1 %v3219_v59  ;;  %2861 = vmatprep.mubr.bf16.mxu0 %v3220_v60  ;;  %v3231_v3 = vld [vmem:[%s3520_s24 + $0x3a8] ss:$20 sps:$4 sm:$0xff]  }
 0x190   : > { %v1625_v7 = vpop.f32.mrf.mxu0  ;;  %v1850_v8 = vpop.f32.mrf.mxu1 }
 0x191   : > { %v3234_v8 = vld [vmem:[%s3520_s24 + $0x46c] ss:$20 sps:$4 sm:$0xff]  }
 0x192   : > { %v3781_v9 = vpop.f32.mrf.mxu0  ;;  %v1851_v10 = vpop.f32.mrf.mxu1 }
 0x193   : > { %v3786_v15 = vadd.f32 %v1851_v10, %v3684_v19  ;;  %v3235_v10 = vld [vmem:[%s3520_s24 + $0x3d0] ss:$20 sps:$4 sm:$0xff]  }
 0x194   : > { %v1628_v23 = vpop.f32.mrf.mxu0  ;;  %v1853_v16 = vpop.f32.mrf.mxu1 }
 0x196   : > { %v3790_v24 = vpop.f32.mrf.mxu0  ;;  %v1856_v25 = vpop.f32.mrf.mxu1  ;;  %2047 = vmatmul.mubr.bf16.gmra.mxu1 %v3217_v11  ;;  %2862 = vmatmul.mubr.bf16.gmra.mxu0 %v3221_v14 }
 0x197   : > { %v3793_v26 = vadd.f32 %v1856_v25, %v3692_v27  ;;  %2054 = vmatprep.mubr.bf16.mxu1 %v3224_v21  ;;  %2865 = vmatprep.mubr.bf16.mxu0 %v3225_v22 }
 0x198   : > { %v1633_v19 = vpop.f32.mrf.mxu0  ;;  %v1858_v33 = vpop.f32.mrf.mxu1 }
 0x199   : > { %v3232_v19 = vld [vmem:[%s3520_s24 + $0x468] ss:$20 sps:$4 sm:$0xff]   ;;  %v3236_v33 = vld [vmem:[%s3520_s24 + $0x3f8] ss:$20 sps:$4 sm:$0xff]  }
 0x19a   : > { %v3795_v34 = vpop.f32.mrf.mxu0  ;;  %v1859_v37 = vpop.f32.mrf.mxu1 }
 0x19b   : > { %v3800_v42 = vadd.f32 %v1859_v37, %v3696_v31 }
 0x19c   : > { %v1636_v49 = vpop.f32.mrf.mxu0  ;;  %v1861_v27 = vpop.f32.mrf.mxu1 }
 0x19e   : > { %v3804_v50 = vpop.f32.mrf.mxu0  ;;  %v1864_v57 = vpop.f32.mrf.mxu1  ;;  %2055 = vmatmul.mubr.bf16.gmra.mxu1 %v3222_v38  ;;  %2866 = vmatmul.mubr.bf16.gmra.mxu0 %v3226_v41  ;;  %v3239_v38 = vld [vmem:[%s3520_s24 + $0x494] ss:$20 sps:$4 sm:$0xff]  }
 0x19f   : > { %v3807_v58 = vadd.f32 %v1864_v57, %v3704_v39  ;;  %2062 = vmatprep.mubr.bf16.mxu1 %v3229_v45  ;;  %2869 = vmatprep.mubr.bf16.mxu0 %v3230_v46  ;;  %v3240_v41 = vld [vmem:[%s3520_s24 + $0x420] ss:$20 sps:$4 sm:$0xff]  }
 0x1a0   : > { %v1641_v31 = vpop.f32.mrf.mxu0  ;;  %v1866_v59 = vpop.f32.mrf.mxu1 }
 0x1a2   : > { %v3809_v60 = vpop.f32.mrf.mxu0  ;;  %v1867_v61 = vpop.f32.mrf.mxu1 }
 0x1a3   : > { %v3814_v7 = vadd.f32 %v1867_v61, %v3708_v43  ;;  %v3237_v61 = vld [vmem:[%s3520_s24 + $0x490] ss:$20 sps:$4 sm:$0xff]  }
 0x1a4   : > { %v1644_v11 = vpop.f32.mrf.mxu0  ;;  %v1869_v39 = vpop.f32.mrf.mxu1 }
 0x1a6   : > { %v3818_v14 = vpop.f32.mrf.mxu0  ;;  %v1872_v21 = vpop.f32.mrf.mxu1  ;;  %2063 = vmatmul.mubr.bf16.gmra.mxu1 %v3227_v62  ;;  %2870 = vmatmul.mubr.bf16.gmra.mxu0 %v3231_v3  ;;  %v3241_v62 = vld [vmem:[%s3520_s24 + $0x448] ss:$20 sps:$4 sm:$0xff]  }
 0x1a7   : > { %v3821_v22 = vadd.f32 %v1872_v21, %v3716_v51  ;;  %2070 = vmatprep.mubr.bf16.mxu1 %v3234_v8  ;;  %2873 = vmatprep.mubr.bf16.mxu0 %v3235_v10  ;;  %v3244_v8 = vld [vmem:[%s3520_s24 + $0x4bc] ss:$20 sps:$4 sm:$0xff]  }
 0x1a8   : > { %v1649_v43 = vpop.f32.mrf.mxu0  ;;  %v1874_v23 = vpop.f32.mrf.mxu1  ;;  %v3245_v10 = vld [vmem:[%s3520_s24 + $0x470] ss:$20 sps:$4 sm:$0xff]  }
 0x1aa   : > { %v3823_v16 = vpop.f32.mrf.mxu0  ;;  %v1875_v25 = vpop.f32.mrf.mxu1 }
 0x1ab   : > { %v3828_v37 = vadd.f32 %v1875_v25, %v3720_v55 }
 0x1ac   : > { %v1652_v45 = vpop.f32.mrf.mxu0  ;;  %v1877_v51 = vpop.f32.mrf.mxu1 }
 0x1ad   : > { %v3249_v45 = vld [vmem:[%s3520_s24 + $0x4e4] ss:$20 sps:$4 sm:$0xff]   ;;  %v3250_v51 = vld [vmem:[%s3520_s24 + $0x4c0] ss:$20 sps:$4 sm:$0xff]  }
 0x1ae   : > { %v3832_v46 = vpop.f32.mrf.mxu0  ;;  %v1880_v49 = vpop.f32.mrf.mxu1  ;;  %2071 = vmatmul.mubr.bf16.gmra.mxu1 %v3232_v19  ;;  %2874 = vmatmul.mubr.bf16.gmra.mxu0 %v3236_v33  ;;  %v3242_v33 = vld [vmem:[%s3520_s24 + $0x4b8] ss:$20 sps:$4 sm:$0xff]  }
 0x1af   : > { %v3835_v27 = vadd.f32 %v1880_v49, %v3728_v63  ;;  %2078 = vmatprep.mubr.bf16.mxu1 %v3239_v38  ;;  %2877 = vmatprep.mubr.bf16.mxu0 %v3240_v41  ;;  %v3246_v38 = vld [vmem:[%s3520_s24 + $0x498] ss:$20 sps:$4 sm:$0xff]  }
 0x1b0   : > { %v1657_v55 = vpop.f32.mrf.mxu0  ;;  %v1882_v57 = vpop.f32.mrf.mxu1 }
 0x1b2   : > { %v3837_v31 = vpop.f32.mrf.mxu0  ;;  %v1883_v59 = vpop.f32.mrf.mxu1 }
 0x1b3   : > { %v3842_v3 = vadd.f32 %v1883_v59, %v3732_v4 }
 0x1b4   : > { %v1660_v11 = vpop.f32.mrf.mxu0  ;;  %v1885_v63 = vpop.f32.mrf.mxu1 }
 0x1b5   : > { %v3251_v11 = vld [vmem:[%s3520_s24 + $0x4e8] ss:$20 sps:$4 sm:$0xff]  }
 0x1b6   : > { %v3846_v39 = vpop.f32.mrf.mxu0  ;;  %v1888_v21 = vpop.f32.mrf.mxu1  ;;  %2079 = vmatmul.mubr.bf16.gmra.mxu1 %v3237_v61  ;;  %2878 = vmatmul.mubr.bf16.gmra.mxu0 %v3241_v62 }
 0x1b7   : > { %v3849_v43 = vadd.f32 %v1888_v21, %v3740_v12  ;;  %2086 = vmatprep.mubr.bf16.mxu1 %v3244_v8  ;;  %2881 = vmatprep.mubr.bf16.mxu0 %v3245_v10  ;;  %v3247_v10 = vld [vmem:[%s3520_s24 + $0x4e0] ss:$20 sps:$4 sm:$0xff]  }
 0x1b8   : > { %v1665_v4 = vpop.f32.mrf.mxu0  ;;  %v1890_v23 = vpop.f32.mrf.mxu1 }
 0x1ba   : > { %v3851_v25 = vpop.f32.mrf.mxu0  ;;  %v1891_v19 = vpop.f32.mrf.mxu1 }
 0x1bb   : > { %v3856_v41 = vadd.f32 %v1891_v19, %v3744_v18 }
 0x1bc   : > { %v1668_v49 = vpop.f32.mrf.mxu0  ;;  %v1893_v55 = vpop.f32.mrf.mxu1 }
 0x1be   : > { %v3860_v12 = vpop.f32.mrf.mxu0  ;;  %v1896_v57 = vpop.f32.mrf.mxu1  ;;  %2087 = vmatmul.mubr.bf16.gmra.mxu1 %v3242_v33  ;;  %2882 = vmatmul.mubr.bf16.gmra.mxu0 %v3246_v38 }
 0x1bf   : > { %v3863_v59 = vadd.f32 %v1896_v57, %v3752_v29  ;;  %2094 = vmatprep.mubr.bf16.mxu1 %v3249_v45  ;;  %2885 = vmatprep.mubr.bf16.mxu0 %v3250_v51 }
 0x1c0   : > { %v1673_v61 = vpop.f32.mrf.mxu0  ;;  %v1898_v62 = vpop.f32.mrf.mxu1 }
 0x1c2   : > { %v3865_v18 = vpop.f32.mrf.mxu0  ;;  %v1899_v8 = vpop.f32.mrf.mxu1 }
 0x1c3   : > { %v3870_v63 = vadd.f32 %v1899_v8, %v3756_v35 }
 0x1c4   : > { %v1676_v21 = vpop.f32.mrf.mxu0  ;;  %v1901_v4 = vpop.f32.mrf.mxu1 }
 0x1c6   : > { %v3872_v23 = vpop.f32.mrf.mxu0  ;;  %v1904_v19 = vpop.f32.mrf.mxu1  ;;  %2095 = vmatmul.mubr.bf16.gmra.mxu1 %v3247_v10  ;;  %2886 = vmatmul.mubr.bf16.gmra.mxu0 %v3251_v11 }
 0x1c7   : > { %v3875_v29 = vadd.f32 %v1904_v19, %v3764_v47 }
 0x1c8   : > { %v1681_v33 = vpop.f32.mrf.mxu0  ;;  %v1906_v38 = vpop.f32.mrf.mxu1 }
 0x1ca   : > { %v3877_v45 = vpop.f32.mrf.mxu0  ;;  %v1907_v51 = vpop.f32.mrf.mxu1 }
 0x1cb   : > { %v3880_v49 = vadd.f32 %v1907_v51, %v3768_v53 }
 0x1cc   : > { %v1684_v35 = vpop.f32.mrf.mxu0  ;;  %v1909_v55 = vpop.f32.mrf.mxu1 }
 0x1ce   : > { %v3882_v57 = vpop.f32.mrf.mxu0  ;;  %v1912_v61 = vpop.f32.mrf.mxu1 }
 0x1cf   : > { %v3885_v62 = vadd.f32 %v1912_v61, %v3776_v2 }
 0x1d0   : > { %v1689_v8 = vpop.f32.mrf.mxu0  ;;  %v1914_v10 = vpop.f32.mrf.mxu1 }
 0x1d2   : > { %v3887_v47 = vpop.f32.mrf.mxu0  ;;  %v1915_v11 = vpop.f32.mrf.mxu1 }
 0x1d3   : > { %v3890_v21 = vadd.f32 %v1915_v11, %v3781_v9 }
 0x1d4   : > { %v1692_v4 = vpop.f32.mrf.mxu0  ;;  %v1917_v19 = vpop.f32.mrf.mxu1 }
 0x1d6   : > { %v3892_v53 = vpop.f32.mrf.mxu0  ;;  %v1920_v33 = vpop.f32.mrf.mxu1 }
 0x1d7   : > { %v3895_v38 = vadd.f32 %v1920_v33, %v3790_v24 }
 0x1d8   : > { %v1697_v51 = vpop.f32.mrf.mxu0  ;;  %v1922_v35 = vpop.f32.mrf.mxu1 }
 0x1da   : > { %v3897_v2 = vpop.f32.mrf.mxu0  ;;  %v1923_v55 = vpop.f32.mrf.mxu1 }
 0x1db   : > { %v3900_v61 = vadd.f32 %v1923_v55, %v3795_v34 }
 0x1dc   : > { %v1700_v8 = vpop.f32.mrf.mxu0  ;;  %v1925_v10 = vpop.f32.mrf.mxu1 }
 0x1de   : > { %v3902_v9 = vpop.f32.mrf.mxu0  ;;  %v1928_v11 = vpop.f32.mrf.mxu1 }
 0x1df   : > { %v3905_v4 = vadd.f32 %v1928_v11, %v3804_v50 }
 0x1e0   : > { %v1705_v19 = vpop.f32.mrf.mxu0  ;;  %v1930_v54 = vpop.f32.mrf.mxu1 }
 0x1e2   : > { %v3907_v24 = vpop.f32.mrf.mxu0  ;;  %v1931_v33 = vpop.f32.mrf.mxu1 }
 0x1e3   : > { %v3910_v51 = vadd.f32 %v1931_v33, %v3809_v60 }
 0x1e4   : > { %v1708_v35 = vpop.f32.mrf.mxu0  ;;  %v1933_v36 = vpop.f32.mrf.mxu1 }
 0x1e6   : > { %v3912_v34 = vpop.f32.mrf.mxu0  ;;  %v1936_v55 = vpop.f32.mrf.mxu1 }
 0x1e7   : > { %v3915_v8 = vadd.f32 %v1936_v55, %v3818_v14 }
 0x1e8   : > { %v1713_v10 = vpop.f32.mrf.mxu0  ;;  %v1938_v48 = vpop.f32.mrf.mxu1 }
 0x1ea   : > { %v3917_v50 = vpop.f32.mrf.mxu0  ;;  %v1939_v11 = vpop.f32.mrf.mxu1 }
 0x1eb   : > { %v3920_v54 = vadd.f32 %v1939_v11, %v3823_v16 }
 0x1ec   : > { %v1716_v19 = vpop.f32.mrf.mxu0  ;;  %v1941_v30 = vpop.f32.mrf.mxu1 }
 0x1ee   : > { %v3922_v60 = vpop.f32.mrf.mxu0  ;;  %v1944_v33 = vpop.f32.mrf.mxu1 }
 0x1ef   : > { %v3925_v36 = vadd.f32 %v1944_v33, %v3832_v46 }
 0x1f0   : > { %v1721_v35 = vpop.f32.mrf.mxu0  ;;  %v1946_v5 = vpop.f32.mrf.mxu1 }
 0x1f2   : > { %v3927_v14 = vpop.f32.mrf.mxu0  ;;  %v1947_v55 = vpop.f32.mrf.mxu1 }
 0x1f3   : > { %v3930_v48 = vadd.f32 %v1947_v55, %v3837_v31 }
 0x1f4   : > { %v1724_v10 = vpop.f32.mrf.mxu0  ;;  %v1949_v0 = vpop.f32.mrf.mxu1 }
 0x1f6   : > { %v3932_v16 = vpop.f32.mrf.mxu0  ;;  %v1952_v11 = vpop.f32.mrf.mxu1 }
 0x1f7   : > { %v3935_v30 = vadd.f32 %v1952_v11, %v3846_v39 }
 0x1f8   : > { %v1729_v19 = vpop.f32.mrf.mxu0  ;;  %v1954_v1 = vpop.f32.mrf.mxu1 }
 0x1fa   : > { %v3937_v46 = vpop.f32.mrf.mxu0  ;;  %v1955_v33 = vpop.f32.mrf.mxu1 }
 0x1fb   : > { %v3940_v5 = vadd.f32 %v1955_v33, %v3851_v25 }
 0x1fc   : > { %v1732_v35 = vpop.f32.mrf.mxu0  ;;  %v1957_v13 = vpop.f32.mrf.mxu1 }
 0x1fe   : > { %v3942_v31 = vpop.f32.mrf.mxu0  ;;  %v1960_v0 = vpop.f32.mrf.mxu1 }
 0x1ff   : > { %v3945_v55 = vadd.f32 %v1960_v0, %v3860_v12 }
 0x200   : > { %v1737_v10 = vpop.f32.mrf.mxu0  ;;  %v1962_v39 = vpop.f32.mrf.mxu1 }
 0x202   : > { %v3947_v11 = vpop.f32.mrf.mxu0  ;;  %v1963_v1 = vpop.f32.mrf.mxu1 }
 0x203   : > { %v3950_v19 = vadd.f32 %v1963_v1, %v3865_v18 }
 0x204   : > { %v1740_v44 = vpop.f32.mrf.mxu0  ;;  %v1965_v25 = vpop.f32.mrf.mxu1 }
 0x206   : > { %v3952_v33 = vpop.f32.mrf.mxu0  ;;  %v3954_v13 = vpop.f32.mrf.mxu1 }
 0x208   : > { %v1745_v35 = vpop.f32.mrf.mxu0  ;;  %v1970_v56 = vpop.f32.mrf.mxu1 }
 0x20a   : > { %v3956_v40 = vpop.f32.mrf.mxu0  ;;  %v3958_v12 = vpop.f32.mrf.mxu1 }
 0x20c   : > { %v1748_v0 = vpop.f32.mrf.mxu0  ;;  %v1973_v10 = vpop.f32.mrf.mxu1 }
 0x20e   : > { %v1976_v39 = vpop.f32.mrf.mxu1  ;;  %v2827_v52 = vpop.f32.mrf.mxu0 }
 0x20f   : > { %v3962_v18 = vadd.f32 %v1976_v39, %v3882_v57  ;;  %v2146_v44 = vadd.f32 %v2827_v52, %v3793_v26 }
 0x210   : > { %v1978_v1 = vpop.f32.mrf.mxu1  ;;  %v2137_v25 = vpop.f32.mrf.mxu0 }
 0x211   : > { %2394 = vst [vmem:[%s3965_s17 + $0x10] sm:$0xff] %v2146_v44  ;;  %v2138_v56 = vadd.f32 %v2137_v25, %v3779_v6 }
 0x212   : > { %v1979_v35 = vpop.f32.mrf.mxu1  ;;  %v2828_v0 = vpop.f32.mrf.mxu0 }
 0x213   : > { %2392 = vst [vmem:[%s3965_s17] sm:$0xff] %v2138_v56  ;;  %v3971_v57 = vadd.f32 %v1979_v35, %v3887_v47  ;;  %v2149_v52 = vadd.f32 %v2828_v0, %v3800_v42 }
 0x214   : > { %v1981_v26 = vpop.f32.mrf.mxu1  ;;  %v2140_v10 = vpop.f32.mrf.mxu0 }
 0x215   : > { %2395 = vst [vmem:[%s3965_s17 + $0x18] sm:$0xff] %v2149_v52  ;;  %v2141_v39 = vadd.f32 %v2140_v10, %v3786_v15 }
 0x216   : > { %v3976_v1 = vpop.f32.mrf.mxu1  ;;  %v2831_v44 = vpop.f32.mrf.mxu0 }
 0x217   : > { %2393 = vst [vmem:[%s3965_s17 + $0x8] sm:$0xff] %v2141_v39  ;;  %v2162_v6 = vadd.f32 %v2831_v44, %v3821_v22 }
 0x218   : > { %v1986_v25 = vpop.f32.mrf.mxu1  ;;  %v2153_v56 = vpop.f32.mrf.mxu0 }
 0x219   : > { %2398 = vst [vmem:[%s3965_s17 + $0x30] sm:$0xff] %v2162_v6  ;;  %v2154_v47 = vadd.f32 %v2153_v56, %v3807_v58 }
 0x21a   : > { %v3982_v42 = vpop.f32.mrf.mxu1  ;;  %v2832_v35 = vpop.f32.mrf.mxu0 }
 0x21b   : > { %2396 = vst [vmem:[%s3965_s17 + $0x20] sm:$0xff] %v2154_v47  ;;  %v2165_v15 = vadd.f32 %v2832_v35, %v3828_v37 }
 0x21c   : > { %v1989_v0 = vpop.f32.mrf.mxu1  ;;  %v2156_v52 = vpop.f32.mrf.mxu0 }
 0x21d   : > { %2399 = vst [vmem:[%s3965_s17 + $0x38] sm:$0xff] %v2165_v15  ;;  %v2157_v26 = vadd.f32 %v2156_v52, %v3814_v7 }
 0x21e   : > { %v3988_v22 = vpop.f32.mrf.mxu1  ;;  %v2835_v10 = vpop.f32.mrf.mxu0 }
 0x21f   : > { %2397 = vst [vmem:[%s3965_s17 + $0x28] sm:$0xff] %v2157_v26  ;;  %v2178_v58 = vadd.f32 %v2835_v10, %v3849_v43 }
 0x220   : > { %v1994_v39 = vpop.f32.mrf.mxu1  ;;  %v2169_v44 = vpop.f32.mrf.mxu0 }
 0x221   : > { %2402 = vst [vmem:[%s3965_s17 + $0x50] sm:$0xff] %v2178_v58  ;;  %v2170_v6 = vadd.f32 %v2169_v44, %v3835_v27 }
 0x222   : > { %v3994_v37 = vpop.f32.mrf.mxu1  ;;  %v2836_v25 = vpop.f32.mrf.mxu0 }
 0x223   : > { %2400 = vst [vmem:[%s3965_s17 + $0x40] sm:$0xff] %v2170_v6  ;;  %v2181_v7 = vadd.f32 %v2836_v25, %v3856_v41 }
 0x224   : > { %v1997_v56 = vpop.f32.mrf.mxu1  ;;  %v2172_v47 = vpop.f32.mrf.mxu0 }
 0x225   : > { %2403 = vst [vmem:[%s3965_s17 + $0x58] sm:$0xff] %v2181_v7  ;;  %v2173_v35 = vadd.f32 %v2172_v47, %v3842_v3 }
 0x226   : > { %v4000_v43 = vpop.f32.mrf.mxu1  ;;  %v2839_v15 = vpop.f32.mrf.mxu0 }
 0x227   : > { %2401 = vst [vmem:[%s3965_s17 + $0x48] sm:$0xff] %v2173_v35  ;;  %v2194_v27 = vadd.f32 %v2839_v15, %v3875_v29 }
 0x228   : > { %v2002_v0 = vpop.f32.mrf.mxu1  ;;  %v2185_v52 = vpop.f32.mrf.mxu0 }
 0x229   : > { %2406 = vst [vmem:[%s3965_s17 + $0x70] sm:$0xff] %v2194_v27  ;;  %v2186_v26 = vadd.f32 %v2185_v52, %v3863_v59 }
 0x22a   : > { %v4006_v41 = vpop.f32.mrf.mxu1  ;;  %v2840_v10 = vpop.f32.mrf.mxu0 }
 0x22b   : > { %2404 = vst [vmem:[%s3965_s17 + $0x60] sm:$0xff] %v2186_v26  ;;  %v2197_v3 = vadd.f32 %v2840_v10, %v3880_v49 }
 0x22c   : > { %v2005_v58 = vpop.f32.mrf.mxu1  ;;  %v2188_v39 = vpop.f32.mrf.mxu0 }
 0x22d   : > { %2407 = vst [vmem:[%s3965_s17 + $0x78] sm:$0xff] %v2197_v3  ;;  %v2189_v44 = vadd.f32 %v2188_v39, %v3870_v63 }
 0x22e   : > { %v4012_v29 = vpop.f32.mrf.mxu1  ;;  %v2843_v6 = vpop.f32.mrf.mxu0 }
 0x22f   : > { %2405 = vst [vmem:[%s3965_s17 + $0x68] sm:$0xff] %v2189_v44  ;;  %v2210_v59 = vadd.f32 %v2843_v6, %v3895_v38 }
 0x230   : > { %v2010_v25 = vpop.f32.mrf.mxu1  ;;  %v2201_v7 = vpop.f32.mrf.mxu0 }
 0x231   : > { %2410 = vst [vmem:[%s3965_s17 + $0x90] sm:$0xff] %v2210_v59  ;;  %v2202_v56 = vadd.f32 %v2201_v7, %v3885_v62 }
 0x232   : > { %v4018_v49 = vpop.f32.mrf.mxu1  ;;  %v2844_v47 = vpop.f32.mrf.mxu0 }
 0x233   : > { %2408 = vst [vmem:[%s3965_s17 + $0x80] sm:$0xff] %v2202_v56  ;;  %v2213_v63 = vadd.f32 %v2844_v47, %v3900_v61 }
 0x234   : > { %v2013_v35 = vpop.f32.mrf.mxu1  ;;  %v2204_v15 = vpop.f32.mrf.mxu0 }
 0x235   : > { %2411 = vst [vmem:[%s3965_s17 + $0x98] sm:$0xff] %v2213_v63  ;;  %v2205_v27 = vadd.f32 %v2204_v15, %v3890_v21  ;;  %v1969_v35 = vadd.f32 %v3954_v13, %v3872_v23 }
 0x236   : > { %v4024_v38 = vpop.f32.mrf.mxu1  ;;  %v2847_v0 = vpop.f32.mrf.mxu0 }
 0x237   : > { %2409 = vst [vmem:[%s3965_s17 + $0x88] sm:$0xff] %v2205_v27  ;;  %v2226_v62 = vadd.f32 %v2847_v0, %v3915_v8 }
 0x238   : > { %v2018_v52 = vpop.f32.mrf.mxu1  ;;  %v2217_v26 = vpop.f32.mrf.mxu0 }
 0x239   : > { %2414 = vst [vmem:[%s3965_s17 + $0xb0] sm:$0xff] %v2226_v62  ;;  %v2218_v10 = vadd.f32 %v2217_v26, %v3905_v4 }
 0x23a   : > { %v4030_v61 = vpop.f32.mrf.mxu1  ;;  %v2848_v3 = vpop.f32.mrf.mxu0 }
 0x23b   : > { %2412 = vst [vmem:[%s3965_s17 + $0xa0] sm:$0xff] %v2218_v10  ;;  %v2229_v21 = vadd.f32 %v2848_v3, %v3920_v54  ;;  %v1985_v3 = vadd.f32 %v3976_v1, %v3892_v53 }
 0x23c   : > { %v2021_v58 = vpop.f32.mrf.mxu1  ;;  %v2220_v39 = vpop.f32.mrf.mxu0 }
 0x23d   : > { %2415 = vst [vmem:[%s3965_s17 + $0xb8] sm:$0xff] %v2229_v21  ;;  %v2221_v44 = vadd.f32 %v2220_v39, %v3910_v51 }
 0x23e   : > { %v4036_v8 = vpop.f32.mrf.mxu1  ;;  %v2851_v6 = vpop.f32.mrf.mxu0 }
 0x23f   : > { %2413 = vst [vmem:[%s3965_s17 + $0xa8] sm:$0xff] %v2221_v44  ;;  %v2242_v59 = vadd.f32 %v2851_v6, %v3935_v30  ;;  %v1988_v44 = vadd.f32 %v3982_v42, %v3897_v2 }
 0x240   : > { %v2026_v4 = vpop.f32.mrf.mxu1  ;;  %v2233_v25 = vpop.f32.mrf.mxu0 }
 0x241   : > { %2418 = vst [vmem:[%s3965_s17 + $0xd0] sm:$0xff] %v2242_v59  ;;  %v2234_v7 = vadd.f32 %v2233_v25, %v3925_v36  ;;  %v2001_v25 = vadd.f32 %v4000_v43, %v3912_v34 }
 0x242   : > { %v4042_v56 = vpop.f32.mrf.mxu1  ;;  %v2852_v54 = vpop.f32.mrf.mxu0 }
 0x243   : > { %2416 = vst [vmem:[%s3965_s17 + $0xc0] sm:$0xff] %v2234_v7  ;;  %v2245_v51 = vadd.f32 %v2852_v54, %v3940_v5  ;;  %v1972_v5 = vadd.f32 %v3958_v12, %v3877_v45 }
 0x244   : > { %v2029_v47 = vpop.f32.mrf.mxu1  ;;  %v2236_v63 = vpop.f32.mrf.mxu0 }
 0x245   : > { %2419 = vst [vmem:[%s3965_s17 + $0xd8] sm:$0xff] %v2245_v51  ;;  %v2237_v30 = vadd.f32 %v2236_v63, %v3930_v48  ;;  %v2004_v63 = vadd.f32 %v4006_v41, %v3917_v50 }
 0x246   : > { %v4050_v15 = vpop.f32.mrf.mxu1  ;;  %v2855_v36 = vpop.f32.mrf.mxu0 }
 0x247   : > { %2417 = vst [vmem:[%s3965_s17 + $0xc8] sm:$0xff] %v2237_v30  ;;  %v2258_v27 = vadd.f32 %v2855_v36, %v1969_v35  ;;  %v2017_v36 = vadd.f32 %v4024_v38, %v3932_v16 }
 0x248   : > { %v2034_v0 = vpop.f32.mrf.mxu1  ;;  %v2249_v62 = vpop.f32.mrf.mxu0 }
 0x249   : > { %2422 = vst [vmem:[%s3965_s17 + $0xf0] sm:$0xff] %v2258_v27  ;;  %v2250_v52 = vadd.f32 %v2249_v62, %v3945_v55  ;;  %v2009_v0 = vadd.f32 %v4012_v29, %v3922_v60 }
 0x24a   : > { %v4057_v26 = vpop.f32.mrf.mxu1  ;;  %v2856_v23 = vpop.f32.mrf.mxu0 }
 0x24b   : > { %2420 = vst [vmem:[%s3965_s17 + $0xe0] sm:$0xff] %v2250_v52  ;;  %v2261_v48 = vadd.f32 %v2856_v23, %v1972_v5  ;;  %v2020_v5 = vadd.f32 %v4030_v61, %v3937_v46  ;;  %v2012_v23 = vadd.f32 %v4018_v49, %v3927_v14 }
 0x24c   : > { %v2037_v13 = vpop.f32.mrf.mxu1  ;;  %v2252_v10 = vpop.f32.mrf.mxu0 }
 0x24d   : > { %2423 = vst [vmem:[%s3965_s17 + $0xf8] sm:$0xff] %v2261_v48  ;;  %v2253_v21 = vadd.f32 %v2252_v10, %v3950_v19  ;;  %v2033_v13 = vadd.f32 %v4050_v15, %v3952_v33 }
 0x24e   : > { %v4064_v58 = vpop.f32.mrf.mxu1  ;;  %v2859_v45 = vpop.f32.mrf.mxu0 }
 0x24f   : > { %2421 = vst [vmem:[%s3965_s17 + $0xe8] sm:$0xff] %v2253_v21  ;;  %v2274_v55 = vadd.f32 %v2859_v45, %v1985_v3  ;;  %v2025_v3 = vadd.f32 %v4036_v8, %v3942_v31  ;;  %v2036_v45 = vadd.f32 %v4057_v26, %v3956_v40  ;;  %v2041_v26 = vadd.f32 %v4064_v58, %v3682_v17  ;;  %v4226_v58 = vld [vmem:[#allocation13_spill] sm:$0xff] }
 0x250   : > { %v2042_v12 = vpop.f32.mrf.mxu1  ;;  %v2265_v39 = vpop.f32.mrf.mxu0 }
 0x251   : > { %2426 = vst [vmem:[%s3965_s17 + $0x110] sm:$0xff] %v2274_v55  ;;  %v2266_v6 = vadd.f32 %v2265_v39, %v3962_v18  ;;  %v1993_v18 = vadd.f32 %v3988_v22, %v3902_v9  ;;  %v2028_v12 = vadd.f32 %v4042_v56, %v3947_v11 }
 0x252   : > { %v4071_v59 = vpop.f32.mrf.mxu1  ;;  %v2860_v53 = vpop.f32.mrf.mxu0 }
 0x253   : > { %2424 = vst [vmem:[%s3965_s17 + $0x100] sm:$0xff] %v2266_v6  ;;  %v2277_v19 = vadd.f32 %v2860_v53, %v1988_v44 }
 0x254   : > { %v2045_v1 = vpop.f32.mrf.mxu1  ;;  %v2268_v4 = vpop.f32.mrf.mxu0 }
 0x255   : > { %2427 = vst [vmem:[%s3965_s17 + $0x118] sm:$0xff] %v2277_v19  ;;  %v2269_v7 = vadd.f32 %v2268_v4, %v3971_v57  ;;  %v1996_v57 = vadd.f32 %v3994_v37, %v3907_v24 }
 0x256   : > { %v2048_v54 = vpop.f32.mrf.mxu1  ;;  %v2863_v2 = vpop.f32.mrf.mxu0 }
 0x257   : > { %2425 = vst [vmem:[%s3965_s17 + $0x108] sm:$0xff] %v2269_v7  ;;  %v2290_v42 = vadd.f32 %v2863_v2, %v2001_v25  ;;  %v2049_v44 = vadd.f32 %v2048_v54, %v3694_v28  ;;  %v2044_v7 = vadd.f32 %v4071_v59, %v3686_v20  ;;  %v4228_v20 = vld [vmem:[#allocation14_spill] sm:$0xff] }
 0x258   : > { %v2050_v51 = vpop.f32.mrf.mxu1  ;;  %v2281_v47 = vpop.f32.mrf.mxu0 }
 0x259   : > { %2430 = vst [vmem:[%s3965_s17 + $0x130] sm:$0xff] %v2290_v42  ;;  %v2282_v34 = vadd.f32 %v2281_v47, %v1993_v18  ;;  %v4227_v47 = vld [vmem:[#allocation11_spill] sm:$0xff] }
 0x25a   : > { %v2051_v43 = vpop.f32.mrf.mxu1  ;;  %v2864_v35 = vpop.f32.mrf.mxu0 }
 0x25b   : > { %2428 = vst [vmem:[%s3965_s17 + $0x120] sm:$0xff] %v2282_v34  ;;  %v2293_v30 = vadd.f32 %v2864_v35, %v2004_v63  ;;  %v2052_v56 = vadd.f32 %v2051_v43, %v3698_v32 }
 0x25c   : > { %v2053_v9 = vpop.f32.mrf.mxu1  ;;  %v2284_v22 = vpop.f32.mrf.mxu0 }
 0x25d   : > { %2431 = vst [vmem:[%s3965_s17 + $0x138] sm:$0xff] %v2293_v30  ;;  %v2285_v27 = vadd.f32 %v2284_v22, %v1996_v57  ;;  %v4229_v22 = vld [vmem:[#allocation12_spill] sm:$0xff] }
 0x25e   : > { %v2056_v50 = vpop.f32.mrf.mxu1  ;;  %v2867_v41 = vpop.f32.mrf.mxu0 }
 0x25f   : > { %2429 = vst [vmem:[%s3965_s17 + $0x128] sm:$0xff] %v2285_v27  ;;  %v2306_v62 = vadd.f32 %v2867_v41, %v2017_v36  ;;  %v2057_v63 = vadd.f32 %v2056_v50, %v4227_v47  ;;  %v4230_v50 = vld [vmem:[#allocation17_spill] sm:$0xff] }
 0x260   : > { %v2058_v24 = vpop.f32.mrf.mxu1  ;;  %v2297_v37 = vpop.f32.mrf.mxu0 }
 0x261   : > { %2434 = vst [vmem:[%s3965_s17 + $0x150] sm:$0xff] %v2306_v62  ;;  %v2298_v52 = vadd.f32 %v2297_v37, %v2009_v0 }
 0x262   : > { %v2059_v16 = vpop.f32.mrf.mxu1  ;;  %v2868_v38 = vpop.f32.mrf.mxu0 }
 0x263   : > { %2432 = vst [vmem:[%s3965_s17 + $0x140] sm:$0xff] %v2298_v52  ;;  %v2309_v48 = vadd.f32 %v2868_v38, %v2020_v5  ;;  %v2060_v36 = vadd.f32 %v2059_v16, %v4229_v22  ;;  %v4231_v52 = vld [vmem:[#allocation15_spill] sm:$0xff]  ;;  %v4232_v16 = vld [vmem:[#allocation18_spill] sm:$0xff] }
 0x264   : > { %v2061_v60 = vpop.f32.mrf.mxu1  ;;  %v2300_v29 = vpop.f32.mrf.mxu0 }
 0x265   : > { %2435 = vst [vmem:[%s3965_s17 + $0x158] sm:$0xff] %v2309_v48  ;;  %v2301_v10 = vadd.f32 %v2300_v29, %v2012_v23 }
 0x266   : > { %v2064_v46 = vpop.f32.mrf.mxu1  ;;  %v2871_v61 = vpop.f32.mrf.mxu0 }
 0x267   : > { %2433 = vst [vmem:[%s3965_s17 + $0x148] sm:$0xff] %v2301_v10  ;;  %v2322_v21 = vadd.f32 %v2871_v61, %v2033_v13  ;;  %v2065_v18 = vadd.f32 %v2064_v46, %v4226_v58  ;;  %v4233_v61 = vld [vmem:[#allocation16_spill] sm:$0xff] }
 0x268   : > { %v2066_v14 = vpop.f32.mrf.mxu1  ;;  %v2313_v49 = vpop.f32.mrf.mxu0 }
 0x269   : > { %2438 = vst [vmem:[%s3965_s17 + $0x170] sm:$0xff] %v2322_v21  ;;  %v2314_v55 = vadd.f32 %v2313_v49, %v2025_v3 }
 0x26a   : > { %v2067_v33 = vpop.f32.mrf.mxu1  ;;  %v2872_v15 = vpop.f32.mrf.mxu0 }
 0x26b   : > { %2436 = vst [vmem:[%s3965_s17 + $0x160] sm:$0xff] %v2314_v55  ;;  %v2325_v39 = vadd.f32 %v2872_v15, %v2036_v45  ;;  %v2068_v59 = vadd.f32 %v2067_v33, %v4228_v20  ;;  %v4234_v15 = vld [vmem:[#allocation19_spill] sm:$0xff] }
 0x26c   : > { %v2069_v31 = vpop.f32.mrf.mxu1  ;;  %v2316_v8 = vpop.f32.mrf.mxu0 }
 0x26d   : > { %2439 = vst [vmem:[%s3965_s17 + $0x178] sm:$0xff] %v2325_v39  ;;  %v2317_v6 = vadd.f32 %v2316_v8, %v2028_v12  ;;  %v4235_v39 = vld [vmem:[#allocation21_spill] sm:$0xff] }
 0x26e   : > { %v2072_v53 = vpop.f32.mrf.mxu1  ;;  %v2875_v40 = vpop.f32.mrf.mxu0 }
 0x26f   : > { %2437 = vst [vmem:[%s3965_s17 + $0x168] sm:$0xff] %v2317_v6  ;;  %v2338_v19 = vadd.f32 %v2875_v40, %v2049_v44  ;;  %v2073_v38 = vadd.f32 %v2072_v53, %v4231_v52 }
 0x270   : > { %v2074_v1 = vpop.f32.mrf.mxu1  ;;  %v2329_v11 = vpop.f32.mrf.mxu0 }
 0x271   : > { %2442 = vst [vmem:[%s3965_s17 + $0x190] sm:$0xff] %v2338_v19  ;;  %v2330_v4 = vadd.f32 %v2329_v11, %v2041_v26  ;;  %v4236_v19 = vld [vmem:[#allocation20_spill] sm:$0xff]  ;;  %v4237_v11 = vld [vmem:[#allocation22_spill] sm:$0xff] }
 0x272   : > { %v2075_v25 = vpop.f32.mrf.mxu1  ;;  %v2876_v28 = vpop.f32.mrf.mxu0 }
 0x273   : > { %2440 = vst [vmem:[%s3965_s17 + $0x180] sm:$0xff] %v2330_v4  ;;  %v2341_v54 = vadd.f32 %v2876_v28, %v2052_v56  ;;  %v2076_v3 = vadd.f32 %v2075_v25, %v4233_v61 }
 0x274   : > { %v2077_v2 = vpop.f32.mrf.mxu1  ;;  %v2332_v17 = vpop.f32.mrf.mxu0 }
 0x275   : > { %2443 = vst [vmem:[%s3965_s17 + $0x198] sm:$0xff] %v2341_v54  ;;  %v2333_v42 = vadd.f32 %v2332_v17, %v2044_v7 }
 0x276   : > { %v2080_v51 = vpop.f32.mrf.mxu1  ;;  %v2879_v32 = vpop.f32.mrf.mxu0 }
 0x277   : > { %2441 = vst [vmem:[%s3965_s17 + $0x188] sm:$0xff] %v2333_v42  ;;  %v2354_v34 = vadd.f32 %v2879_v32, %v2065_v18  ;;  %v2081_v62 = vadd.f32 %v2080_v51, %v4230_v50 }
 0x278   : > { %v2082_v43 = vpop.f32.mrf.mxu1  ;;  %v2345_v35 = vpop.f32.mrf.mxu0 }
 0x279   : > { %2446 = vst [vmem:[%s3965_s17 + $0x1b0] sm:$0xff] %v2354_v34  ;;  %v2346_v57 = vadd.f32 %v2345_v35, %v2057_v63 }
 0x27a   : > { %v2083_v30 = vpop.f32.mrf.mxu1  ;;  %v2880_v9 = vpop.f32.mrf.mxu0 }
 0x27b   : > { %2444 = vst [vmem:[%s3965_s17 + $0x1a0] sm:$0xff] %v2346_v57  ;;  %v2357_v27 = vadd.f32 %v2880_v9, %v2068_v59  ;;  %v2084_v29 = vadd.f32 %v2083_v30, %v4232_v16 }
 0x27c   : > { %v2085_v41 = vpop.f32.mrf.mxu1  ;;  %v2348_v0 = vpop.f32.mrf.mxu0 }
 0x27d   : > { %2447 = vst [vmem:[%s3965_s17 + $0x1b8] sm:$0xff] %v2357_v27  ;;  %v2349_v24 = vadd.f32 %v2348_v0, %v2060_v36 }
 0x27e   : > { %v2088_v37 = vpop.f32.mrf.mxu1  ;;  %v2883_v5 = vpop.f32.mrf.mxu0 }
 0x27f   : > { %2445 = vst [vmem:[%s3965_s17 + $0x1a8] sm:$0xff] %v2349_v24  ;;  %v2370_v23 = vadd.f32 %v2883_v5, %v2081_v62  ;;  %v2089_v12 = vadd.f32 %v2088_v37, %v4234_v15 }
 0x280   : > { %v2090_v48 = vpop.f32.mrf.mxu1  ;;  %v2361_v60 = vpop.f32.mrf.mxu0 }
 0x281   : > { %2450 = vst [vmem:[%s3965_s17 + $0x1d0] sm:$0xff] %v2370_v23  ;;  %v2362_v13 = vadd.f32 %v2361_v60, %v2073_v38 }
 0x282   : > { %v2091_v10 = vpop.f32.mrf.mxu1  ;;  %v2884_v46 = vpop.f32.mrf.mxu0 }
 0x283   : > { %2448 = vst [vmem:[%s3965_s17 + $0x1c0] sm:$0xff] %v2362_v13  ;;  %v2373_v21 = vadd.f32 %v2884_v46, %v2084_v29  ;;  %v2092_v1 = vadd.f32 %v2091_v10, %v4236_v19 }
 0x284   : > { %v2093_v14 = vpop.f32.mrf.mxu1  ;;  %v2364_v49 = vpop.f32.mrf.mxu0 }
 0x285   : > { %2451 = vst [vmem:[%s3965_s17 + $0x1d8] sm:$0xff] %v2373_v21  ;;  %v2365_v45 = vadd.f32 %v2364_v49, %v2076_v3 }
 0x286   : > { %v2096_v55 = vpop.f32.mrf.mxu1  ;;  %v2887_v33 = vpop.f32.mrf.mxu0 }
 0x287   : > { %2449 = vst [vmem:[%s3965_s17 + $0x1c8] sm:$0xff] %v2365_v45  ;;  %v2097_v31 = vadd.f32 %v2096_v55, %v4235_v39 }
 0x288   : > { %v2098_v8 = vpop.f32.mrf.mxu1  ;;  %v2377_v44 = vpop.f32.mrf.mxu0 }
 0x289   : > { %v2386_v6 = vadd.f32 %v2887_v33, %v2097_v31  ;;  %v2378_v53 = vadd.f32 %v2377_v44, %v2089_v12 }
 0x28a   : > { %v2099_v40 = vpop.f32.mrf.mxu1  ;;  %v2888_v26 = vpop.f32.mrf.mxu0 }
 0x28b   : > { %2454 = vst [vmem:[%s3965_s17 + $0x1f0] sm:$0xff] %v2386_v6  ;;  %2452 = vst [vmem:[%s3965_s17 + $0x1e0] sm:$0xff] %v2378_v53  ;;  %v2100_v56 = vadd.f32 %v2099_v40, %v4237_v11 }
 0x28c   : > { %v2101_v4 = vpop.f32.mrf.mxu1  ;;  %v2380_v25 = vpop.f32.mrf.mxu0 }
 0x28d   : > { %v2389_v28 = vadd.f32 %v2888_v26, %v2100_v56  ;;  %v2381_v7 = vadd.f32 %v2380_v25, %v2092_v1 }
 0x28f   : > { %2455 = vst [vmem:[%s3965_s17 + $0x1f8] sm:$0xff] %v2389_v28  ;;  %2453 = vst [vmem:[%s3965_s17 + $0x1e8] sm:$0xff] %v2381_v7 }
 0x290   : > { %3319 = shalt.err (!%p3316_p0)
}
 0x291   : > { %s3320_s4 = scalar_lea.hbm %s4150_s25, 8192  ;;  %s3324_s7 = scalar_lea.hbm %s4198_s2, 32768 }
 0x292   : > { %p3321_p5 = scmp.ne.s32.totalorder %s4150_s25, %s3320_s4  ;;  %p3325_p4 = scmp.lt.s32.totalorder %s4150_s25, %s4198_s2 }
 0x293   : > { %p3326_p6 = scmp.lt.s32.totalorder %s3324_s7, %s3320_s4 }
 0x294   : > { %p3322_p9 = pnand %p3321_p5, %p4238_p10 }
 0x295   : > { %p3327_p8 = por %p3326_p6, %p3325_p4 }
 0x296   : > { %p3323_p1 = pneg %p3322_p9 }
 0x298   : > { %p3328_p3 = pnand %p3327_p8, %p3323_p1 }
 0x29a   : > { %3331 = shalt.err (!%p3328_p3)
}
 0x29b   : > { %s3384_s24 = smov 128   ;;  %s3385_s15 = smov 8  }
 0x29c   : > { %2930 = dma.vmem_to_hbm [thread:$0]  (%p4238_p10), %s4152_s14, 8192, %s4150_s25, %s2457_s13, %s3384_s24, %s3384_s24, %s3385_s15  }
 0x29d PF: > { %p2947_p7 = scmp.ge.s32.totalorder %s3374_s12, 2  ;;  %s2485_s17 = sand.u32 1, %s3362_s9  }
 0x29e   : > { %p4239_p11 = scmp.ne.s32.totalorder %s4204_s16, 0  ;;  %s2486_s8 = scalar_lea.sflag [#allocation4], %s2485_s17 }
 0x2a0   : > { %p2941_p12 = pnand %p2947_p7, %p4239_p11 }
 0x2a2   : > { %p2942_p2 = pneg %p2941_p12 }
 0x2a4   : > { %3357 = dma.done.wait (%p2942_p2), %s2486_s8, 8192  }
 0x2a5   : > { %3359 = vsyncadd (%p2942_p2), %s2486_s8, 4294959104  ;;  %p16_p13 = scmp.ge.s32.totalorder %s3454_s21, 6   ;;  %s4240_s9 = smov %s3366_s10 }
 0x2a6   : > { %s4241_s10 = smov %s3370_s11  ;;  %s4242_s11 = smov %s3471_s29 }
 0x2a7   : > { %s4243_s12 = smov %s3454_s21  ;;  %18 = sbr.rel (!%p16_p13) target bundleno = 6 (0x6), region = 77 }
 0x2ac   :  { %2491 = vsyncpa [#allocation3], 1 }
 0x2ad   :  { %2493 = vsyncpa [#allocation3 + $0x1], 1 }
 0x2ae   :  { %2494 = vsyncpa [#allocation6], 1 }
 0x2af   :  { %2495 = vsyncpa [#allocation4], 1 }
 0x2b0   :  { %2497 = vsyncpa [#allocation4 + $0x1], 1 }

</bundles_post_ra>
